<compile_context>
chip_gen: v7x
topology: tpu7x:2x2x1
jax: 0.10.0
libtpu: 0.0.40
codegen_flags: <defaults>
</compile_context>

<pallas_src>
import jax
import jax.numpy as jnp
from jax import lax
from jax.experimental import pallas as pl
from jax.experimental.pallas import tpu as pltpu


# ----------------------------- Pallas kernel -------------------------------


def vcl_mlp_kernel(x_ref,
                   w1mu_ref, w1sig_ref, eps1_ref, b1_ref,
                   w2mu_ref, w2sig_ref, eps2_ref, b2_ref,
                   w3mu_ref, w3sig_ref, eps3_ref, b3_ref,
                   out_ref):
    """Fused n-sample mean-field MLP forward for one batch tile.

    x_ref   : (tb, Din)        bf16
    w*mu/sig: (in, out)        bf16   (resident across the batch grid)
    eps*    : (S, in, out)     bf16
    b*      : (S, 1, out)      f32    (pre-sampled biases; tiny)
    out_ref : (tb, out_pad)    f32    (lane-dense, padded head)
    """
    n_samples = eps1_ref.shape[0]
    f32 = jnp.float32
    bf16 = jnp.bfloat16

    x = x_ref[...]                                   # (tb, Din) bf16

    # Hoist the f32 upcasts of mu/sigma out of the sample loop.
    w1mu = w1mu_ref[...].astype(f32)
    w1sig = w1sig_ref[...].astype(f32)
    w2mu = w2mu_ref[...].astype(f32)
    w2sig = w2sig_ref[...].astype(f32)
    w3mu = w3mu_ref[...].astype(f32)
    w3sig = w3sig_ref[...].astype(f32)

    def sample_step(s, acc):
        # Mean-field sampling on the VPU right before each MXU dot.
        w1 = (w1mu + w1sig * eps1_ref[s].astype(f32)).astype(bf16)
        h1 = jnp.dot(x, w1, preferred_element_type=f32) + b1_ref[s]
        h1 = jnp.maximum(h1, 0.0).astype(bf16)

        w2 = (w2mu + w2sig * eps2_ref[s].astype(f32)).astype(bf16)
        h2 = jnp.dot(h1, w2, preferred_element_type=f32) + b2_ref[s]
        h2 = jnp.maximum(h2, 0.0).astype(bf16)

        w3 = (w3mu + w3sig * eps3_ref[s].astype(f32)).astype(bf16)
        logits = jnp.dot(h2, w3, preferred_element_type=f32) + b3_ref[s]
        return acc + logits

    acc0 = jnp.zeros(out_ref.shape, f32)
    acc = lax.fori_loop(0, n_samples, sample_step, acc0, unroll=True)
    out_ref[...] = acc * (1.0 / n_samples)


def vcl_forward_pallas(x,
                       w1_mu, w1_sig, eps1, b1,
                       w2_mu, w2_sig, eps2, b2,
                       w3_mu, w3_sig, eps3, b3,
                       *, batch_tile=128):
    """x: (B, Din). Weight params are (in, out) bf16; eps: (S, in, out) bf16;
    b*: (S, 1, out) f32 pre-sampled biases. Layer-3 arrays are padded to a
    lane-dense out width (multiple of 128). Returns (B, out_pad) f32."""
    B, Din = x.shape
    H = w1_mu.shape[1]
    Hp = w3_mu.shape[1]                  # padded head width (lane-dense)
    S = eps1.shape[0]

    x = x.astype(jnp.bfloat16)
    tb = min(B, batch_tile)
    n_bt = pl.cdiv(B, tb)

    def resident(shape):
        # Constant block index -> DMA'd once, VMEM-resident across batch tiles.
        return pl.BlockSpec(shape, lambda i, _s=shape: (0,) * len(_s))

    grid_spec = pltpu.PrefetchScalarGridSpec(
        num_scalar_prefetch=0,
        grid=(n_bt,),
        in_specs=[
            pl.BlockSpec((tb, Din), lambda i: (i, 0)),
            resident((Din, H)), resident((Din, H)),
            resident((S, Din, H)), resident((S, 1, H)),
            resident((H, H)), resident((H, H)),
            resident((S, H, H)), resident((S, 1, H)),
            resident((H, Hp)), resident((H, Hp)),
            resident((S, H, Hp)), resident((S, 1, Hp)),
        ],
        out_specs=pl.BlockSpec((tb, Hp), lambda i: (i, 0)),
    )

    wbytes = (Din * H + H * H + H * Hp) * 2          # one bf16 weight set
    cost = pl.CostEstimate(
        flops=2 * B * S * (Din * H + H * H + H * Hp),
        transcendentals=0,
        bytes_accessed=(B * Din * 2            # x (bf16)
                        + 2 * wbytes           # mu + sigma
                        + S * wbytes           # eps
                        + S * (2 * H + Hp) * 4  # sampled biases (f32)
                        + B * Hp * 4),         # output (f32)
    )

    return pl.pallas_call(
        vcl_mlp_kernel,
        out_shape=jax.ShapeDtypeStruct((B, Hp), jnp.float32),
        grid_spec=grid_spec,
        compiler_params=pltpu.CompilerParams(
            dimension_semantics=("parallel",)),
        cost_estimate=cost,
    )(x, w1_mu, w1_sig, eps1, b1,
      w2_mu, w2_sig, eps2, b2,
      w3_mu, w3_sig, eps3, b3)


# --------------------------- Parameter utilities ----------------------------


def init_mean_field_linear(key, in_features, out_features):
    """Mirror MeanFieldLinear.__init__ (deterministic via key)."""
    kw, kb = jax.random.split(key)
    w_mu = 0.1 * jax.random.normal(kw, (out_features, in_features), jnp.float32)
    b_mu = 0.1 * jax.random.normal(kb, (out_features,), jnp.float32)
    w_rho = jnp.full((out_features, in_features), -6.0, jnp.float32)
    b_rho = jnp.full((out_features,), -6.0, jnp.float32)
    return w_mu, w_rho, b_mu, b_rho


def prep_layer(key, w_mu, w_rho, b_mu, b_rho, n_samples, pad_out_to=None):
    """Build kernel inputs for one MeanFieldLinear:
    weight mu/sigma transposed to (in, out) in bf16, per-sample weight eps in
    bf16, pre-sampled biases (S, 1, out) in f32; optionally zero-pad the out
    dimension to a lane-dense width."""
    kw, kb = jax.random.split(key)
    w_mu_t = w_mu.T                                  # (in, out)
    w_sig_t = jnp.exp(0.5 * w_rho).T                 # (in, out)
    eps_w = jax.random.normal(kw, (n_samples,) + w_mu_t.shape, jnp.float32)
    b_sig = jnp.exp(0.5 * b_rho)
    eps_b = jax.random.normal(kb, (n_samples,) + b_mu.shape, jnp.float32)
    b_s = (b_mu[None, :] + b_sig[None, :] * eps_b)[:, None, :]   # (S, 1, out)

    if pad_out_to is not None and pad_out_to > w_mu_t.shape[1]:
        pad = pad_out_to - w_mu_t.shape[1]
        w_mu_t = jnp.pad(w_mu_t, ((0, 0), (0, pad)))
        w_sig_t = jnp.pad(w_sig_t, ((0, 0), (0, pad)))
        eps_w = jnp.pad(eps_w, ((0, 0), (0, 0), (0, pad)))
        b_s = jnp.pad(b_s, ((0, 0), (0, 0), (0, pad)))

    return (w_mu_t.astype(jnp.bfloat16), w_sig_t.astype(jnp.bfloat16),
            eps_w.astype(jnp.bfloat16), b_s)


# -------------------------- Pure-JAX reference ------------------------------


def ref_forward(x, layers, n_samples):
    """Mirrors the kernel's numerics (bf16 weights/activations, f32 acc)."""
    (w1_mu, w1_sig, e1, b1), (w2_mu, w2_sig, e2, b2), (w3_mu, w3_sig, e3, b3) = layers
    f32, bf16 = jnp.float32, jnp.bfloat16
    xb = x.astype(bf16)
    acc = jnp.zeros((x.shape[0], w3_mu.shape[1]), f32)
    for s in range(n_samples):
        w1 = (w1_mu.astype(f32) + w1_sig.astype(f32) * e1[s].astype(f32)).astype(bf16)
        h1 = jnp.dot(xb, w1, preferred_element_type=f32) + b1[s]
        h1 = jnp.maximum(h1, 0.0).astype(bf16)
        w2 = (w2_mu.astype(f32) + w2_sig.astype(f32) * e2[s].astype(f32)).astype(bf16)
        h2 = jnp.dot(h1, w2, preferred_element_type=f32) + b2[s]
        h2 = jnp.maximum(h2, 0.0).astype(bf16)
        w3 = (w3_mu.astype(f32) + w3_sig.astype(f32) * e3[s].astype(f32)).astype(bf16)
        logits = jnp.dot(h2, w3, preferred_element_type=f32) + b3[s]
        acc = acc + logits
    return acc / n_samples


# --------------------------------- Main -------------------------------------


if __name__ == "__main__":
    # Small shapes consistent with the module (784/100/10 shrunk to aligned sizes).
    batch = 8
    input_size = 256
    hidden_size = 128
    output_size = 10          # real head width
    out_pad = 128             # lane-dense head width inside the kernel
    n_samples = 3

    root = jax.random.PRNGKey(0)
    k_x, k_l1, k_l2, k_l3, k_s1, k_s2, k_s3 = jax.random.split(root, 7)

    x = jax.random.normal(k_x, (batch, input_size), jnp.float32)

    lin1 = init_mean_field_linear(k_l1, input_size, hidden_size)
    lin2 = init_mean_field_linear(k_l2, hidden_size, hidden_size)
    lin3 = init_mean_field_linear(k_l3, hidden_size, output_size)

    l1 = prep_layer(k_s1, *lin1, n_samples)
    l2 = prep_layer(k_s2, *lin2, n_samples)
    l3 = prep_layer(k_s3, *lin3, n_samples, pad_out_to=out_pad)

    out_padded = vcl_forward_pallas(x, *l1, *l2, *l3)
    out_padded = jax.block_until_ready(out_padded)
    out = out_padded[:, :output_size]

    ref_padded = ref_forward(x, (l1, l2, l3), n_samples)

    assert out.shape == (batch, output_size)
    max_err = jnp.max(jnp.abs(out_padded - ref_padded))
    assert jnp.allclose(out_padded, ref_padded, atol=2e-2, rtol=2e-2), (
        f"max abs err {max_err}")

    print("KERNEL_OK")
</pallas_src>

<mosaic_0001>
module attributes {stable_mosaic.version = 11 : i64} {
  func.func @vcl_mlp_kernel(%arg0: i32, %arg1: memref<8x256xbf16, #tpu.memory_space<vmem>>, %arg2: memref<256x128xbf16, #tpu.memory_space<vmem>>, %arg3: memref<256x128xbf16, #tpu.memory_space<vmem>>, %arg4: memref<3x256x128xbf16, #tpu.memory_space<vmem>>, %arg5: memref<3x1x128xf32, #tpu.memory_space<vmem>>, %arg6: memref<128x128xbf16, #tpu.memory_space<vmem>>, %arg7: memref<128x128xbf16, #tpu.memory_space<vmem>>, %arg8: memref<3x128x128xbf16, #tpu.memory_space<vmem>>, %arg9: memref<3x1x128xf32, #tpu.memory_space<vmem>>, %arg10: memref<128x128xbf16, #tpu.memory_space<vmem>>, %arg11: memref<128x128xbf16, #tpu.memory_space<vmem>>, %arg12: memref<3x128x128xbf16, #tpu.memory_space<vmem>>, %arg13: memref<3x1x128xf32, #tpu.memory_space<vmem>>, %arg14: memref<8x128xf32, #tpu.memory_space<vmem>>) attributes {dimension_semantics = [#tpu.dimension_semantics<parallel>], iteration_bounds = array<i64: 1>, scalar_prefetch = 0 : i64, scratch_operands = 0 : i64, tpu.core_type = #tpu.core_type<tc>, window_params = [{transform_indices = @transform_0, window_bounds = array<i64: 8, 256>}, {pipeline_mode = #tpu.pipeline_mode<synchronous>, transform_indices = @transform_1, window_bounds = array<i64: 256, 128>}, {pipeline_mode = #tpu.pipeline_mode<synchronous>, transform_indices = @transform_2, window_bounds = array<i64: 256, 128>}, {pipeline_mode = #tpu.pipeline_mode<synchronous>, transform_indices = @transform_3, window_bounds = array<i64: 3, 256, 128>}, {pipeline_mode = #tpu.pipeline_mode<synchronous>, transform_indices = @transform_4, window_bounds = array<i64: 3, 1, 128>}, {pipeline_mode = #tpu.pipeline_mode<synchronous>, transform_indices = @transform_5, window_bounds = array<i64: 128, 128>}, {pipeline_mode = #tpu.pipeline_mode<synchronous>, transform_indices = @transform_6, window_bounds = array<i64: 128, 128>}, {pipeline_mode = #tpu.pipeline_mode<synchronous>, transform_indices = @transform_7, window_bounds = array<i64: 3, 128, 128>}, {pipeline_mode = #tpu.pipeline_mode<synchronous>, transform_indices = @transform_8, window_bounds = array<i64: 3, 1, 128>}, {pipeline_mode = #tpu.pipeline_mode<synchronous>, transform_indices = @transform_9, window_bounds = array<i64: 128, 128>}, {pipeline_mode = #tpu.pipeline_mode<synchronous>, transform_indices = @transform_10, window_bounds = array<i64: 128, 128>}, {pipeline_mode = #tpu.pipeline_mode<synchronous>, transform_indices = @transform_11, window_bounds = array<i64: 3, 128, 128>}, {pipeline_mode = #tpu.pipeline_mode<synchronous>, transform_indices = @transform_12, window_bounds = array<i64: 3, 1, 128>}, {transform_indices = @transform_13, window_bounds = array<i64: 8, 128>}]} {
    %c0 = arith.constant 0 : index
    %c0_0 = arith.constant 0 : index
    %0 = vector.load %arg1[%c0, %c0_0] : memref<8x256xbf16, #tpu.memory_space<vmem>>, vector<8x256xbf16>
    %c0_1 = arith.constant 0 : index
    %c0_2 = arith.constant 0 : index
    %1 = vector.load %arg2[%c0_1, %c0_2] : memref<256x128xbf16, #tpu.memory_space<vmem>>, vector<256x128xbf16>
    %2 = arith.extf %1 : vector<256x128xbf16> to vector<256x128xf32>
    %c0_3 = arith.constant 0 : index
    %c0_4 = arith.constant 0 : index
    %3 = vector.load %arg3[%c0_3, %c0_4] : memref<256x128xbf16, #tpu.memory_space<vmem>>, vector<256x128xbf16>
    %4 = arith.extf %3 : vector<256x128xbf16> to vector<256x128xf32>
    %c0_5 = arith.constant 0 : index
    %c0_6 = arith.constant 0 : index
    %5 = vector.load %arg6[%c0_5, %c0_6] : memref<128x128xbf16, #tpu.memory_space<vmem>>, vector<128x128xbf16>
    %6 = arith.extf %5 : vector<128x128xbf16> to vector<128x128xf32>
    %c0_7 = arith.constant 0 : index
    %c0_8 = arith.constant 0 : index
    %7 = vector.load %arg7[%c0_7, %c0_8] : memref<128x128xbf16, #tpu.memory_space<vmem>>, vector<128x128xbf16>
    %8 = arith.extf %7 : vector<128x128xbf16> to vector<128x128xf32>
    %c0_9 = arith.constant 0 : index
    %c0_10 = arith.constant 0 : index
    %9 = vector.load %arg10[%c0_9, %c0_10] : memref<128x128xbf16, #tpu.memory_space<vmem>>, vector<128x128xbf16>
    %10 = arith.extf %9 : vector<128x128xbf16> to vector<128x128xf32>
    %c0_11 = arith.constant 0 : index
    %c0_12 = arith.constant 0 : index
    %11 = vector.load %arg11[%c0_11, %c0_12] : memref<128x128xbf16, #tpu.memory_space<vmem>>, vector<128x128xbf16>
    %12 = arith.extf %11 : vector<128x128xbf16> to vector<128x128xf32>
    %cst = arith.constant 0.000000e+00 : f32
    %13 = vector.broadcast %cst : f32 to vector<8x128xf32>
    %c0_i32 = arith.constant 0 : i32
    %14 = arith.index_cast %c0_i32 : i32 to index
    %c0_13 = arith.constant 0 : index
    %c0_14 = arith.constant 0 : index
    %15 = vector.load %arg4[%14, %c0_13, %c0_14] : memref<3x256x128xbf16, #tpu.memory_space<vmem>>, vector<1x256x128xbf16>
    %16 = vector.shape_cast %15 : vector<1x256x128xbf16> to vector<256x128xbf16>
    %17 = arith.extf %16 : vector<256x128xbf16> to vector<256x128xf32>
    %18 = arith.mulf %4, %17 : vector<256x128xf32>
    %19 = arith.addf %2, %18 : vector<256x128xf32>
    %20 = arith.truncf %19 : vector<256x128xf32> to vector<256x128xbf16>
    %cst_15 = arith.constant dense<0.000000e+00> : vector<8x128xf32>
    %21 = tpu.matmul %0, %20, %cst_15 {dimension_numbers = #tpu.dot_dimension_numbers<[1], [0], [0], [1], [0, 0, 1, 1], [], []>} : vector<8x256xbf16>, vector<256x128xbf16>, vector<8x128xf32> -> vector<8x128xf32>
    %22 = arith.index_cast %c0_i32 : i32 to index
    %c0_16 = arith.constant 0 : index
    %c0_17 = arith.constant 0 : index
    %23 = vector.load %arg5[%22, %c0_16, %c0_17] : memref<3x1x128xf32, #tpu.memory_space<vmem>>, vector<1x1x128xf32>
    %24 = vector.shape_cast %23 : vector<1x1x128xf32> to vector<1x128xf32>
    %25 = vector.broadcast %24 : vector<1x128xf32> to vector<8x128xf32>
    %26 = arith.addf %21, %25 : vector<8x128xf32>
    %cst_18 = arith.constant 0.000000e+00 : f32
    %27 = vector.broadcast %cst_18 : f32 to vector<8x128xf32>
    %28 = arith.maximumf %26, %27 : vector<8x128xf32>
    %29 = arith.truncf %28 : vector<8x128xf32> to vector<8x128xbf16>
    %30 = arith.index_cast %c0_i32 : i32 to index
    %c0_19 = arith.constant 0 : index
    %c0_20 = arith.constant 0 : index
    %31 = vector.load %arg8[%30, %c0_19, %c0_20] : memref<3x128x128xbf16, #tpu.memory_space<vmem>>, vector<1x128x128xbf16>
    %32 = vector.shape_cast %31 : vector<1x128x128xbf16> to vector<128x128xbf16>
    %33 = arith.extf %32 : vector<128x128xbf16> to vector<128x128xf32>
    %34 = arith.mulf %8, %33 : vector<128x128xf32>
    %35 = arith.addf %6, %34 : vector<128x128xf32>
    %36 = arith.truncf %35 : vector<128x128xf32> to vector<128x128xbf16>
    %cst_21 = arith.constant dense<0.000000e+00> : vector<8x128xf32>
    %37 = tpu.matmul %29, %36, %cst_21 {dimension_numbers = #tpu.dot_dimension_numbers<[1], [0], [0], [1], [0, 0, 1, 1], [], []>} : vector<8x128xbf16>, vector<128x128xbf16>, vector<8x128xf32> -> vector<8x128xf32>
    %38 = arith.index_cast %c0_i32 : i32 to index
    %c0_22 = arith.constant 0 : index
    %c0_23 = arith.constant 0 : index
    %39 = vector.load %arg9[%38, %c0_22, %c0_23] : memref<3x1x128xf32, #tpu.memory_space<vmem>>, vector<1x1x128xf32>
    %40 = vector.shape_cast %39 : vector<1x1x128xf32> to vector<1x128xf32>
    %41 = vector.broadcast %40 : vector<1x128xf32> to vector<8x128xf32>
    %42 = arith.addf %37, %41 : vector<8x128xf32>
    %cst_24 = arith.constant 0.000000e+00 : f32
    %43 = vector.broadcast %cst_24 : f32 to vector<8x128xf32>
    %44 = arith.maximumf %42, %43 : vector<8x128xf32>
    %45 = arith.truncf %44 : vector<8x128xf32> to vector<8x128xbf16>
    %46 = arith.index_cast %c0_i32 : i32 to index
    %c0_25 = arith.constant 0 : index
    %c0_26 = arith.constant 0 : index
    %47 = vector.load %arg12[%46, %c0_25, %c0_26] : memref<3x128x128xbf16, #tpu.memory_space<vmem>>, vector<1x128x128xbf16>
    %48 = vector.shape_cast %47 : vector<1x128x128xbf16> to vector<128x128xbf16>
    %49 = arith.extf %48 : vector<128x128xbf16> to vector<128x128xf32>
    %50 = arith.mulf %12, %49 : vector<128x128xf32>
    %51 = arith.addf %10, %50 : vector<128x128xf32>
    %52 = arith.truncf %51 : vector<128x128xf32> to vector<128x128xbf16>
    %cst_27 = arith.constant dense<0.000000e+00> : vector<8x128xf32>
    %53 = tpu.matmul %45, %52, %cst_27 {dimension_numbers = #tpu.dot_dimension_numbers<[1], [0], [0], [1], [0, 0, 1, 1], [], []>} : vector<8x128xbf16>, vector<128x128xbf16>, vector<8x128xf32> -> vector<8x128xf32>
    %54 = arith.index_cast %c0_i32 : i32 to index
    %c0_28 = arith.constant 0 : index
    %c0_29 = arith.constant 0 : index
    %55 = vector.load %arg13[%54, %c0_28, %c0_29] : memref<3x1x128xf32, #tpu.memory_space<vmem>>, vector<1x1x128xf32>
    %56 = vector.shape_cast %55 : vector<1x1x128xf32> to vector<1x128xf32>
    %57 = vector.broadcast %56 : vector<1x128xf32> to vector<8x128xf32>
    %58 = arith.addf %53, %57 : vector<8x128xf32>
    %59 = arith.addf %13, %58 : vector<8x128xf32>
    %c1_i32 = arith.constant 1 : i32
    %60 = arith.index_cast %c1_i32 : i32 to index
    %c0_30 = arith.constant 0 : index
    %c0_31 = arith.constant 0 : index
    %61 = vector.load %arg4[%60, %c0_30, %c0_31] : memref<3x256x128xbf16, #tpu.memory_space<vmem>>, vector<1x256x128xbf16>
    %62 = vector.shape_cast %61 : vector<1x256x128xbf16> to vector<256x128xbf16>
    %63 = arith.extf %62 : vector<256x128xbf16> to vector<256x128xf32>
    %64 = arith.mulf %4, %63 : vector<256x128xf32>
    %65 = arith.addf %2, %64 : vector<256x128xf32>
    %66 = arith.truncf %65 : vector<256x128xf32> to vector<256x128xbf16>
    %cst_32 = arith.constant dense<0.000000e+00> : vector<8x128xf32>
    %67 = tpu.matmul %0, %66, %cst_32 {dimension_numbers = #tpu.dot_dimension_numbers<[1], [0], [0], [1], [0, 0, 1, 1], [], []>} : vector<8x256xbf16>, vector<256x128xbf16>, vector<8x128xf32> -> vector<8x128xf32>
    %68 = arith.index_cast %c1_i32 : i32 to index
    %c0_33 = arith.constant 0 : index
    %c0_34 = arith.constant 0 : index
    %69 = vector.load %arg5[%68, %c0_33, %c0_34] : memref<3x1x128xf32, #tpu.memory_space<vmem>>, vector<1x1x128xf32>
    %70 = vector.shape_cast %69 : vector<1x1x128xf32> to vector<1x128xf32>
    %71 = vector.broadcast %70 : vector<1x128xf32> to vector<8x128xf32>
    %72 = arith.addf %67, %71 : vector<8x128xf32>
    %cst_35 = arith.constant 0.000000e+00 : f32
    %73 = vector.broadcast %cst_35 : f32 to vector<8x128xf32>
    %74 = arith.maximumf %72, %73 : vector<8x128xf32>
    %75 = arith.truncf %74 : vector<8x128xf32> to vector<8x128xbf16>
    %76 = arith.index_cast %c1_i32 : i32 to index
    %c0_36 = arith.constant 0 : index
    %c0_37 = arith.constant 0 : index
    %77 = vector.load %arg8[%76, %c0_36, %c0_37] : memref<3x128x128xbf16, #tpu.memory_space<vmem>>, vector<1x128x128xbf16>
    %78 = vector.shape_cast %77 : vector<1x128x128xbf16> to vector<128x128xbf16>
    %79 = arith.extf %78 : vector<128x128xbf16> to vector<128x128xf32>
    %80 = arith.mulf %8, %79 : vector<128x128xf32>
    %81 = arith.addf %6, %80 : vector<128x128xf32>
    %82 = arith.truncf %81 : vector<128x128xf32> to vector<128x128xbf16>
    %cst_38 = arith.constant dense<0.000000e+00> : vector<8x128xf32>
    %83 = tpu.matmul %75, %82, %cst_38 {dimension_numbers = #tpu.dot_dimension_numbers<[1], [0], [0], [1], [0, 0, 1, 1], [], []>} : vector<8x128xbf16>, vector<128x128xbf16>, vector<8x128xf32> -> vector<8x128xf32>
    %84 = arith.index_cast %c1_i32 : i32 to index
    %c0_39 = arith.constant 0 : index
    %c0_40 = arith.constant 0 : index
    %85 = vector.load %arg9[%84, %c0_39, %c0_40] : memref<3x1x128xf32, #tpu.memory_space<vmem>>, vector<1x1x128xf32>
    %86 = vector.shape_cast %85 : vector<1x1x128xf32> to vector<1x128xf32>
    %87 = vector.broadcast %86 : vector<1x128xf32> to vector<8x128xf32>
    %88 = arith.addf %83, %87 : vector<8x128xf32>
    %cst_41 = arith.constant 0.000000e+00 : f32
    %89 = vector.broadcast %cst_41 : f32 to vector<8x128xf32>
    %90 = arith.maximumf %88, %89 : vector<8x128xf32>
    %91 = arith.truncf %90 : vector<8x128xf32> to vector<8x128xbf16>
    %92 = arith.index_cast %c1_i32 : i32 to index
    %c0_42 = arith.constant 0 : index
    %c0_43 = arith.constant 0 : index
    %93 = vector.load %arg12[%92, %c0_42, %c0_43] : memref<3x128x128xbf16, #tpu.memory_space<vmem>>, vector<1x128x128xbf16>
    %94 = vector.shape_cast %93 : vector<1x128x128xbf16> to vector<128x128xbf16>
    %95 = arith.extf %94 : vector<128x128xbf16> to vector<128x128xf32>
    %96 = arith.mulf %12, %95 : vector<128x128xf32>
    %97 = arith.addf %10, %96 : vector<128x128xf32>
    %98 = arith.truncf %97 : vector<128x128xf32> to vector<128x128xbf16>
    %cst_44 = arith.constant dense<0.000000e+00> : vector<8x128xf32>
    %99 = tpu.matmul %91, %98, %cst_44 {dimension_numbers = #tpu.dot_dimension_numbers<[1], [0], [0], [1], [0, 0, 1, 1], [], []>} : vector<8x128xbf16>, vector<128x128xbf16>, vector<8x128xf32> -> vector<8x128xf32>
    %100 = arith.index_cast %c1_i32 : i32 to index
    %c0_45 = arith.constant 0 : index
    %c0_46 = arith.constant 0 : index
    %101 = vector.load %arg13[%100, %c0_45, %c0_46] : memref<3x1x128xf32, #tpu.memory_space<vmem>>, vector<1x1x128xf32>
    %102 = vector.shape_cast %101 : vector<1x1x128xf32> to vector<1x128xf32>
    %103 = vector.broadcast %102 : vector<1x128xf32> to vector<8x128xf32>
    %104 = arith.addf %99, %103 : vector<8x128xf32>
    %105 = arith.addf %59, %104 : vector<8x128xf32>
    %c2_i32 = arith.constant 2 : i32
    %106 = arith.index_cast %c2_i32 : i32 to index
    %c0_47 = arith.constant 0 : index
    %c0_48 = arith.constant 0 : index
    %107 = vector.load %arg4[%106, %c0_47, %c0_48] : memref<3x256x128xbf16, #tpu.memory_space<vmem>>, vector<1x256x128xbf16>
    %108 = vector.shape_cast %107 : vector<1x256x128xbf16> to vector<256x128xbf16>
    %109 = arith.extf %108 : vector<256x128xbf16> to vector<256x128xf32>
    %110 = arith.mulf %4, %109 : vector<256x128xf32>
    %111 = arith.addf %2, %110 : vector<256x128xf32>
    %112 = arith.truncf %111 : vector<256x128xf32> to vector<256x128xbf16>
    %cst_49 = arith.constant dense<0.000000e+00> : vector<8x128xf32>
    %113 = tpu.matmul %0, %112, %cst_49 {dimension_numbers = #tpu.dot_dimension_numbers<[1], [0], [0], [1], [0, 0, 1, 1], [], []>} : vector<8x256xbf16>, vector<256x128xbf16>, vector<8x128xf32> -> vector<8x128xf32>
    %114 = arith.index_cast %c2_i32 : i32 to index
    %c0_50 = arith.constant 0 : index
    %c0_51 = arith.constant 0 : index
    %115 = vector.load %arg5[%114, %c0_50, %c0_51] : memref<3x1x128xf32, #tpu.memory_space<vmem>>, vector<1x1x128xf32>
    %116 = vector.shape_cast %115 : vector<1x1x128xf32> to vector<1x128xf32>
    %117 = vector.broadcast %116 : vector<1x128xf32> to vector<8x128xf32>
    %118 = arith.addf %113, %117 : vector<8x128xf32>
    %cst_52 = arith.constant 0.000000e+00 : f32
    %119 = vector.broadcast %cst_52 : f32 to vector<8x128xf32>
    %120 = arith.maximumf %118, %119 : vector<8x128xf32>
    %121 = arith.truncf %120 : vector<8x128xf32> to vector<8x128xbf16>
    %122 = arith.index_cast %c2_i32 : i32 to index
    %c0_53 = arith.constant 0 : index
    %c0_54 = arith.constant 0 : index
    %123 = vector.load %arg8[%122, %c0_53, %c0_54] : memref<3x128x128xbf16, #tpu.memory_space<vmem>>, vector<1x128x128xbf16>
    %124 = vector.shape_cast %123 : vector<1x128x128xbf16> to vector<128x128xbf16>
    %125 = arith.extf %124 : vector<128x128xbf16> to vector<128x128xf32>
    %126 = arith.mulf %8, %125 : vector<128x128xf32>
    %127 = arith.addf %6, %126 : vector<128x128xf32>
    %128 = arith.truncf %127 : vector<128x128xf32> to vector<128x128xbf16>
    %cst_55 = arith.constant dense<0.000000e+00> : vector<8x128xf32>
    %129 = tpu.matmul %121, %128, %cst_55 {dimension_numbers = #tpu.dot_dimension_numbers<[1], [0], [0], [1], [0, 0, 1, 1], [], []>} : vector<8x128xbf16>, vector<128x128xbf16>, vector<8x128xf32> -> vector<8x128xf32>
    %130 = arith.index_cast %c2_i32 : i32 to index
    %c0_56 = arith.constant 0 : index
    %c0_57 = arith.constant 0 : index
    %131 = vector.load %arg9[%130, %c0_56, %c0_57] : memref<3x1x128xf32, #tpu.memory_space<vmem>>, vector<1x1x128xf32>
    %132 = vector.shape_cast %131 : vector<1x1x128xf32> to vector<1x128xf32>
    %133 = vector.broadcast %132 : vector<1x128xf32> to vector<8x128xf32>
    %134 = arith.addf %129, %133 : vector<8x128xf32>
    %cst_58 = arith.constant 0.000000e+00 : f32
    %135 = vector.broadcast %cst_58 : f32 to vector<8x128xf32>
    %136 = arith.maximumf %134, %135 : vector<8x128xf32>
    %137 = arith.truncf %136 : vector<8x128xf32> to vector<8x128xbf16>
    %138 = arith.index_cast %c2_i32 : i32 to index
    %c0_59 = arith.constant 0 : index
    %c0_60 = arith.constant 0 : index
    %139 = vector.load %arg12[%138, %c0_59, %c0_60] : memref<3x128x128xbf16, #tpu.memory_space<vmem>>, vector<1x128x128xbf16>
    %140 = vector.shape_cast %139 : vector<1x128x128xbf16> to vector<128x128xbf16>
    %141 = arith.extf %140 : vector<128x128xbf16> to vector<128x128xf32>
    %142 = arith.mulf %12, %141 : vector<128x128xf32>
    %143 = arith.addf %10, %142 : vector<128x128xf32>
    %144 = arith.truncf %143 : vector<128x128xf32> to vector<128x128xbf16>
    %cst_61 = arith.constant dense<0.000000e+00> : vector<8x128xf32>
    %145 = tpu.matmul %137, %144, %cst_61 {dimension_numbers = #tpu.dot_dimension_numbers<[1], [0], [0], [1], [0, 0, 1, 1], [], []>} : vector<8x128xbf16>, vector<128x128xbf16>, vector<8x128xf32> -> vector<8x128xf32>
    %146 = arith.index_cast %c2_i32 : i32 to index
    %c0_62 = arith.constant 0 : index
    %c0_63 = arith.constant 0 : index
    %147 = vector.load %arg13[%146, %c0_62, %c0_63] : memref<3x1x128xf32, #tpu.memory_space<vmem>>, vector<1x1x128xf32>
    %148 = vector.shape_cast %147 : vector<1x1x128xf32> to vector<1x128xf32>
    %149 = vector.broadcast %148 : vector<1x128xf32> to vector<8x128xf32>
    %150 = arith.addf %145, %149 : vector<8x128xf32>
    %151 = arith.addf %105, %150 : vector<8x128xf32>
    %c3_i32 = arith.constant 3 : i32
    %cst_64 = arith.constant 0.333333343 : f32
    %152 = vector.broadcast %cst_64 : f32 to vector<8x128xf32>
    %153 = arith.mulf %151, %152 : vector<8x128xf32>
    %c0_65 = arith.constant 0 : index
    %c0_66 = arith.constant 0 : index
    %154 = vector.load %arg14[%c0_65, %c0_66] : memref<8x128xf32, #tpu.memory_space<vmem>>, vector<8x128xf32>
    tpu.vector_store %arg14[%c0_65, %c0_66], %153 {strides = array<i32>} : memref<8x128xf32, #tpu.memory_space<vmem>>, vector<8x128xf32>,
    return
  }
  func.func @transform_0(%arg0: i32) -> (i32, i32) {
    %c0_i32 = arith.constant 0 : i32
    %c0_i32_0 = arith.constant 0 : i32
    return %arg0, %c0_i32 : i32, i32
  }
  func.func @transform_1(%arg0: i32) -> (i32, i32) {
    %c0_i32 = arith.constant 0 : i32
    %c0_i32_0 = arith.constant 0 : i32
    %c0_i32_1 = arith.constant 0 : i32
    return %c0_i32, %c0_i32_0 : i32, i32
  }
  func.func @transform_2(%arg0: i32) -> (i32, i32) {
    %c0_i32 = arith.constant 0 : i32
    %c0_i32_0 = arith.constant 0 : i32
    %c0_i32_1 = arith.constant 0 : i32
    return %c0_i32, %c0_i32_0 : i32, i32
  }
  func.func @transform_3(%arg0: i32) -> (i32, i32, i32) {
    %c0_i32 = arith.constant 0 : i32
    %c0_i32_0 = arith.constant 0 : i32
    %c0_i32_1 = arith.constant 0 : i32
    %c0_i32_2 = arith.constant 0 : i32
    return %c0_i32, %c0_i32_0, %c0_i32_1 : i32, i32, i32
  }
  func.func @transform_4(%arg0: i32) -> (i32, i32, i32) {
    %c0_i32 = arith.constant 0 : i32
    %c0_i32_0 = arith.constant 0 : i32
    %c0_i32_1 = arith.constant 0 : i32
    %c0_i32_2 = arith.constant 0 : i32
    return %c0_i32, %c0_i32_0, %c0_i32_1 : i32, i32, i32
  }
  func.func @transform_5(%arg0: i32) -> (i32, i32) {
    %c0_i32 = arith.constant 0 : i32
    %c0_i32_0 = arith.constant 0 : i32
    %c0_i32_1 = arith.constant 0 : i32
    return %c0_i32, %c0_i32_0 : i32, i32
  }
  func.func @transform_6(%arg0: i32) -> (i32, i32) {
    %c0_i32 = arith.constant 0 : i32
    %c0_i32_0 = arith.constant 0 : i32
    %c0_i32_1 = arith.constant 0 : i32
    return %c0_i32, %c0_i32_0 : i32, i32
  }
  func.func @transform_7(%arg0: i32) -> (i32, i32, i32) {
    %c0_i32 = arith.constant 0 : i32
    %c0_i32_0 = arith.constant 0 : i32
    %c0_i32_1 = arith.constant 0 : i32
    %c0_i32_2 = arith.constant 0 : i32
    return %c0_i32, %c0_i32_0, %c0_i32_1 : i32, i32, i32
  }
  func.func @transform_8(%arg0: i32) -> (i32, i32, i32) {
    %c0_i32 = arith.constant 0 : i32
    %c0_i32_0 = arith.constant 0 : i32
    %c0_i32_1 = arith.constant 0 : i32
    %c0_i32_2 = arith.constant 0 : i32
    return %c0_i32, %c0_i32_0, %c0_i32_1 : i32, i32, i32
  }
  func.func @transform_9(%arg0: i32) -> (i32, i32) {
    %c0_i32 = arith.constant 0 : i32
    %c0_i32_0 = arith.constant 0 : i32
    %c0_i32_1 = arith.constant 0 : i32
    return %c0_i32, %c0_i32_0 : i32, i32
  }
  func.func @transform_10(%arg0: i32) -> (i32, i32) {
    %c0_i32 = arith.constant 0 : i32
    %c0_i32_0 = arith.constant 0 : i32
    %c0_i32_1 = arith.constant 0 : i32
    return %c0_i32, %c0_i32_0 : i32, i32
  }
  func.func @transform_11(%arg0: i32) -> (i32, i32, i32) {
    %c0_i32 = arith.constant 0 : i32
    %c0_i32_0 = arith.constant 0 : i32
    %c0_i32_1 = arith.constant 0 : i32
    %c0_i32_2 = arith.constant 0 : i32
    return %c0_i32, %c0_i32_0, %c0_i32_1 : i32, i32, i32
  }
  func.func @transform_12(%arg0: i32) -> (i32, i32, i32) {
    %c0_i32 = arith.constant 0 : i32
    %c0_i32_0 = arith.constant 0 : i32
    %c0_i32_1 = arith.constant 0 : i32
    %c0_i32_2 = arith.constant 0 : i32
    return %c0_i32, %c0_i32_0, %c0_i32_1 : i32, i32, i32
  }
  func.func @transform_13(%arg0: i32) -> (i32, i32) {
    %c0_i32 = arith.constant 0 : i32
    %c0_i32_0 = arith.constant 0 : i32
    return %arg0, %c0_i32 : i32, i32
  }
}

</mosaic_0001>

<bundles_post_ra>
// kernel: tpu_custom_call.1
= control target key start
LH: loop header
LB: loop body
LE: loop exit
PB: predicated region body
PF: predicated region fallthrough
CT: control target
= control target key end

     0   :  { %18 = vsyncpa [#allocation3], 0  ;;  %s4087_s0 = inlined_call_operand.hbm [shape: bf16[8,256], index: 0, kind: input, shape index: {}]   ;;  %s4088_s1 = inlined_call_operand.hbm [shape: bf16[256,128], index: 1, kind: input, shape index: {}]   ;;  %s4089_s2 = inlined_call_operand.hbm [shape: bf16[256,128], index: 2, kind: input, shape index: {}]   ;;  %s4090_s3 = inlined_call_operand.hbm [shape: bf16[3,256,128], index: 3, kind: input, shape index: {}]   ;;  %s4091_s4 = inlined_call_operand.vmem [shape: f32[3,1,128], index: 4, kind: input, shape index: {}]   ;;  %s4092_s5 = inlined_call_operand.hbm [shape: bf16[128,128], index: 5, kind: input, shape index: {}]   ;;  %s4093_s6 = inlined_call_operand.hbm [shape: bf16[128,128], index: 6, kind: input, shape index: {}]   ;;  %s4094_s7 = inlined_call_operand.hbm [shape: bf16[3,128,128], index: 7, kind: input, shape index: {}]   ;;  %s4095_s8 = inlined_call_operand.vmem [shape: f32[3,1,128], index: 8, kind: input, shape index: {}]   ;;  %s4096_s9 = inlined_call_operand.hbm [shape: bf16[128,128], index: 9, kind: input, shape index: {}]   ;;  %s4097_s10 = inlined_call_operand.hbm [shape: bf16[128,128], index: 10, kind: input, shape index: {}]   ;;  %s4098_s11 = inlined_call_operand.hbm [shape: bf16[3,128,128], index: 11, kind: input, shape index: {}]   ;;  %s4099_s12 = inlined_call_operand.vmem [shape: f32[3,1,128], index: 12, kind: input, shape index: {}]   ;;  %s4100_s13 = inlined_call_operand.hbm [shape: f32[8,128], index: 13, kind: output, shape index: {}]  }
   0x1   :  { %19 = vsyncpa [#allocation6], 0 }
   0x2   :  { %20 = vsyncpa [#allocation9], 0 }
   0x3   :  { %21 = vsyncpa [#allocation12], 0 }
   0x4   :  { %22 = vsyncpa [#allocation15], 0 }
   0x5   :  { %23 = vsyncpa [#allocation18], 0 }
   0x6   :  { %24 = vsyncpa [#allocation4], 0  ;;  %s3106_s25 = smov [#allocation5]   ;;  %s2850_s29 = scalar_lea.hbm %s4088_s1, 2048 }
   0x7   :  { %s40_s26 = sshll.u32 %s3106_s25, 4  ;;  %p2851_p0 = scmp.ne.s32.totalorder %s4088_s1, %s2850_s29  ;;  %s41_s26 = int_to_ptr.vmem [resolvable:$true] %s40_s26 }
   0x8   :  { %p2854_p1 = scmp.lt.u32.totalorder %s2850_s29, %s4088_s1 }
   0xa   :  { %p2856_p2 = pnand %p2854_p1, %p2851_p0 }
   0xc   :  { %2859 = shalt.err (!%p2856_p2)
}
   0xd   :  { %s2860_s17 = scalar_lea.vmem %s41_s26, 2048  ;;  %p2865_p4 = scmp.lt.s32.totalorder %s41_s26, %s41_s26 }
   0xe   :  { %p2861_p3 = scmp.ne.s32.totalorder %s41_s26, %s2860_s17  ;;  %p2866_p5 = scmp.lt.s32.totalorder %s2860_s17, %s2860_s17 }
  0x10   :  { %p2867_p6 = por %p2866_p5, %p2865_p4 }
  0x12   :  { %p2868_p7 = pnand %p2867_p6, %p2861_p3 }
  0x14   :  { %2871 = shalt.err (!%p2868_p7)
}
  0x15   :  { %s3107_s18 = smov 64   ;;  %s3108_s19 = smov 4  }
  0x16   :  { %46 = dma.hbm_to_vmem [thread:$0]  %s4088_s1, 2048, %s41_s26, [#allocation6], %s3107_s18, %s3107_s18, %s3108_s19  }
  0x17   :  { %s3109_s22 = smov [#allocation8]   ;;  %s3110_s24 = smov [#allocation11]  }
  0x18   :  { %s64_s23 = sshll.u32 %s3109_s22, 4  ;;  %s90_s25 = sshll.u32 %s3110_s24, 4  ;;  %s65_s23 = int_to_ptr.vmem [resolvable:$true] %s64_s23  ;;  %s91_s25 = int_to_ptr.vmem [resolvable:$true] %s90_s25 }
  0x19   :  { %s2872_s29 = scalar_lea.hbm %s4090_s3, 6144 }
  0x1a   :  { %p2873_p8 = scmp.ne.s32.totalorder %s4090_s3, %s2872_s29  ;;  %p2876_p9 = scmp.lt.u32.totalorder %s2872_s29, %s4090_s3 }
  0x1c   :  { %p2878_p10 = pnand %p2876_p9, %p2873_p8 }
  0x1e   :  { %2881 = shalt.err (!%p2878_p10)
}
  0x1f   :  { %s2882_s1 = scalar_lea.vmem %s65_s23, 6144  ;;  %p2887_p12 = scmp.lt.s32.totalorder %s65_s23, %s65_s23 }
  0x20   :  { %p2883_p11 = scmp.ne.s32.totalorder %s65_s23, %s2882_s1  ;;  %p2888_p13 = scmp.lt.s32.totalorder %s2882_s1, %s2882_s1 }
  0x22   :  { %p2889_p0 = por %p2888_p13, %p2887_p12 }
  0x24   :  { %p2890_p1 = pnand %p2889_p0, %p2883_p11 }
  0x26   :  { %2893 = shalt.err (!%p2890_p1)
}
  0x27   :  { %70 = dma.hbm_to_vmem [thread:$0]  %s4090_s3, 6144, %s65_s23, [#allocation9], %s3107_s18, %s3107_s18, %s3108_s19  }
  0x28   :  { %s2894_s22 = scalar_lea.hbm %s4093_s6, 1024 }
  0x29   :  { %p2895_p2 = scmp.ne.s32.totalorder %s4093_s6, %s2894_s22  ;;  %p2898_p3 = scmp.lt.u32.totalorder %s2894_s22, %s4093_s6 }
  0x2b   :  { %p2900_p4 = pnand %p2898_p3, %p2895_p2 }
  0x2d   :  { %2903 = shalt.err (!%p2900_p4)
}
  0x2e   :  { %s2904_s30 = scalar_lea.vmem %s91_s25, 1024  ;;  %p2909_p6 = scmp.lt.s32.totalorder %s91_s25, %s91_s25 }
  0x2f   :  { %p2905_p5 = scmp.ne.s32.totalorder %s91_s25, %s2904_s30  ;;  %p2910_p7 = scmp.lt.s32.totalorder %s2904_s30, %s2904_s30 }
  0x31   :  { %p2911_p8 = por %p2910_p7, %p2909_p6 }
  0x33   :  { %p2912_p9 = pnand %p2911_p8, %p2905_p5 }
  0x35   :  { %2915 = shalt.err (!%p2912_p9)
}
  0x36   :  { %96 = dma.hbm_to_vmem [thread:$0]  %s4093_s6, 1024, %s91_s25, [#allocation12], %s3107_s18, %s3107_s18, %s3108_s19  }
  0x37   :  { %s3111_s14 = smov [#allocation14]   ;;  %s3112_s16 = smov [#allocation2]  }
  0x38   :  { %s116_s15 = sshll.u32 %s3111_s14, 4  ;;  %s31_s1 = sshll.u32 %s3112_s16, 4  ;;  %s117_s15 = int_to_ptr.vmem [resolvable:$true] %s116_s15  ;;  %s32_s1 = int_to_ptr.vmem [resolvable:$true] %s31_s1 }
  0x39   :  { %s2916_s20 = scalar_lea.hbm %s4096_s9, 1024 }
  0x3a   :  { %p2917_p10 = scmp.ne.s32.totalorder %s4096_s9, %s2916_s20  ;;  %p2920_p11 = scmp.lt.u32.totalorder %s2916_s20, %s4096_s9 }
  0x3c   :  { %p2922_p12 = pnand %p2920_p11, %p2917_p10 }
  0x3e   :  { %2925 = shalt.err (!%p2922_p12)
}
  0x3f   :  { %s2926_s6 = scalar_lea.vmem %s117_s15, 1024  ;;  %p2931_p0 = scmp.lt.s32.totalorder %s117_s15, %s117_s15 }
  0x40   :  { %p2927_p13 = scmp.ne.s32.totalorder %s117_s15, %s2926_s6  ;;  %p2932_p1 = scmp.lt.s32.totalorder %s2926_s6, %s2926_s6 }
  0x42   :  { %p2933_p2 = por %p2932_p1, %p2931_p0 }
  0x44   :  { %p2934_p3 = pnand %p2933_p2, %p2927_p13 }
  0x46   :  { %2937 = shalt.err (!%p2934_p3)
}
  0x47   :  { %122 = dma.hbm_to_vmem [thread:$0]  %s4096_s9, 1024, %s117_s15, [#allocation15], %s3107_s18, %s3107_s18, %s3108_s19  }
  0x48   :  { %s2938_s3 = scalar_lea.hbm %s4087_s0, 128 }
  0x49   :  { %p2939_p4 = scmp.ne.s32.totalorder %s4087_s0, %s2938_s3  ;;  %p2942_p5 = scmp.lt.u32.totalorder %s2938_s3, %s4087_s0 }
  0x4b   :  { %p2944_p6 = pnand %p2942_p5, %p2939_p4 }
  0x4d   :  { %2947 = shalt.err (!%p2944_p6)
}
  0x4e   :  { %s2948_s17 = scalar_lea.vmem %s32_s1, 128  ;;  %p2953_p8 = scmp.lt.s32.totalorder %s32_s1, %s32_s1 }
  0x4f   :  { %p2949_p7 = scmp.ne.s32.totalorder %s32_s1, %s2948_s17  ;;  %p2954_p9 = scmp.lt.s32.totalorder %s2948_s17, %s2948_s17 }
  0x51   :  { %p2955_p10 = por %p2954_p9, %p2953_p8 }
  0x53   :  { %p2956_p11 = pnand %p2955_p10, %p2949_p7 }
  0x55   :  { %2959 = shalt.err (!%p2956_p11)
}
  0x56   :  { %34 = dma.hbm_to_vmem [thread:$0]  %s4087_s0, 128, %s32_s1, [#allocation3]  }
  0x57   :  { %s3113_s20 = smov [#allocation7]   ;;  %s3114_s22 = smov [#allocation10]  }
  0x58   :  { %s52_s21 = sshll.u32 %s3113_s20, 4  ;;  %s78_s24 = sshll.u32 %s3114_s22, 4  ;;  %s53_s21 = int_to_ptr.vmem [resolvable:$true] %s52_s21  ;;  %s79_s24 = int_to_ptr.vmem [resolvable:$true] %s78_s24 }
  0x59   :  { %s2960_s25 = scalar_lea.hbm %s4089_s2, 2048 }
  0x5a   :  { %p2961_p12 = scmp.ne.s32.totalorder %s4089_s2, %s2960_s25  ;;  %p2964_p13 = scmp.lt.u32.totalorder %s2960_s25, %s4089_s2 }
  0x5c   :  { %p2966_p0 = pnand %p2964_p13, %p2961_p12 }
  0x5e   :  { %2969 = shalt.err (!%p2966_p0)
}
  0x5f   :  { %s2970_s0 = scalar_lea.vmem %s53_s21, 2048  ;;  %p2975_p2 = scmp.lt.s32.totalorder %s53_s21, %s53_s21 }
  0x60   :  { %p2971_p1 = scmp.ne.s32.totalorder %s53_s21, %s2970_s0  ;;  %p2976_p3 = scmp.lt.s32.totalorder %s2970_s0, %s2970_s0 }
  0x62   :  { %p2977_p4 = por %p2976_p3, %p2975_p2 }
  0x64   :  { %p2978_p5 = pnand %p2977_p4, %p2971_p1 }
  0x66   :  { %2981 = shalt.err (!%p2978_p5)
}
  0x67   :  { %58 = dma.hbm_to_vmem [thread:$0]  %s4089_s2, 2048, %s53_s21, [#allocation6], %s3107_s18, %s3107_s18, %s3108_s19  }
  0x68   :  { %s2982_s26 = scalar_lea.hbm %s4092_s5, 1024 }
  0x69   :  { %p2983_p6 = scmp.ne.s32.totalorder %s4092_s5, %s2982_s26  ;;  %p2986_p7 = scmp.lt.u32.totalorder %s2982_s26, %s4092_s5 }
  0x6b   :  { %p2988_p8 = pnand %p2986_p7, %p2983_p6 }
  0x6d   :  { %2991 = shalt.err (!%p2988_p8)
}
  0x6e   :  { %s2992_s22 = scalar_lea.vmem %s79_s24, 1024  ;;  %p2997_p10 = scmp.lt.s32.totalorder %s79_s24, %s79_s24 }
  0x6f   :  { %p2993_p9 = scmp.ne.s32.totalorder %s79_s24, %s2992_s22  ;;  %p2998_p11 = scmp.lt.s32.totalorder %s2992_s22, %s2992_s22 }
  0x71   :  { %p2999_p12 = por %p2998_p11, %p2997_p10 }
  0x73   :  { %p3000_p13 = pnand %p2999_p12, %p2993_p9 }
  0x75   :  { %3003 = shalt.err (!%p3000_p13)
}
  0x76   :  { %84 = dma.hbm_to_vmem [thread:$0]  %s4092_s5, 1024, %s79_s24, [#allocation9], %s3107_s18, %s3107_s18, %s3108_s19  }
  0x77   :  { %s3115_s27 = smov [#allocation13]   ;;  %s3116_s25 = smov [#allocation16]  }
  0x78   :  { %s102_s6 = sshll.u32 %s3115_s27, 4  ;;  %s128_s28 = sshll.u32 %s3116_s25, 4  ;;  %s103_s6 = int_to_ptr.vmem [resolvable:$true] %s102_s6  ;;  %s129_s28 = int_to_ptr.vmem [resolvable:$true] %s128_s28 }
  0x79   :  { %s3004_s3 = scalar_lea.hbm %s4094_s7, 3072 }
  0x7a   :  { %p3005_p0 = scmp.ne.s32.totalorder %s4094_s7, %s3004_s3  ;;  %p3008_p1 = scmp.lt.u32.totalorder %s3004_s3, %s4094_s7 }
  0x7c   :  { %p3010_p2 = pnand %p3008_p1, %p3005_p0 }
  0x7e   :  { %3013 = shalt.err (!%p3010_p2)
}
  0x7f   :  { %s3014_s5 = scalar_lea.vmem %s103_s6, 3072  ;;  %p3019_p4 = scmp.lt.s32.totalorder %s103_s6, %s103_s6 }
  0x80   :  { %p3015_p3 = scmp.ne.s32.totalorder %s103_s6, %s3014_s5  ;;  %p3020_p5 = scmp.lt.s32.totalorder %s3014_s5, %s3014_s5 }
  0x82   :  { %p3021_p6 = por %p3020_p5, %p3019_p4 }
  0x84   :  { %p3022_p7 = pnand %p3021_p6, %p3015_p3 }
  0x86   :  { %3025 = shalt.err (!%p3022_p7)
}
  0x87   :  { %108 = dma.hbm_to_vmem [thread:$0]  %s4094_s7, 3072, %s103_s6, [#allocation12], %s3107_s18, %s3107_s18, %s3108_s19  }
  0x88   :  { %s3026_s9 = scalar_lea.hbm %s4097_s10, 1024 }
  0x89   :  { %p3027_p8 = scmp.ne.s32.totalorder %s4097_s10, %s3026_s9  ;;  %p3030_p9 = scmp.lt.u32.totalorder %s3026_s9, %s4097_s10 }
  0x8b   :  { %p3032_p10 = pnand %p3030_p9, %p3027_p8 }
  0x8d   :  { %3035 = shalt.err (!%p3032_p10)
}
  0x8e   :  { %s3036_s21 = scalar_lea.vmem %s129_s28, 1024  ;;  %p3041_p12 = scmp.lt.s32.totalorder %s129_s28, %s129_s28 }
  0x8f   :  { %p3037_p11 = scmp.ne.s32.totalorder %s129_s28, %s3036_s21  ;;  %p3042_p13 = scmp.lt.s32.totalorder %s3036_s21, %s3036_s21 }
  0x91   :  { %p3043_p0 = por %p3042_p13, %p3041_p12 }
  0x93   :  { %p3044_p1 = pnand %p3043_p0, %p3037_p11 }
  0x95   :  { %3047 = shalt.err (!%p3044_p1)
}
  0x96   :  { %134 = dma.hbm_to_vmem [thread:$0]  %s4097_s10, 1024, %s129_s28, [#allocation15], %s3107_s18, %s3107_s18, %s3108_s19  }
  0x97   :  { %s3117_s6 = smov [#allocation17]   ;;  %s3048_s3 = scalar_lea.hbm %s4098_s11, 3072 }
  0x98   :  { %s140_s25 = sshll.u32 %s3117_s6, 4  ;;  %p3049_p2 = scmp.ne.s32.totalorder %s4098_s11, %s3048_s3  ;;  %s141_s25 = int_to_ptr.vmem [resolvable:$true] %s140_s25 }
  0x99   :  { %p3052_p3 = scmp.lt.u32.totalorder %s3048_s3, %s4098_s11 }
  0x9b   :  { %p3054_p4 = pnand %p3052_p3, %p3049_p2 }
  0x9d   :  { %3057 = shalt.err (!%p3054_p4)
}
  0x9e   :  { %s3058_s5 = scalar_lea.vmem %s141_s25, 3072  ;;  %p3063_p6 = scmp.lt.s32.totalorder %s141_s25, %s141_s25 }
  0x9f   :  { %p3059_p5 = scmp.ne.s32.totalorder %s141_s25, %s3058_s5  ;;  %p3064_p7 = scmp.lt.s32.totalorder %s3058_s5, %s3058_s5 }
  0xa1   :  { %p3065_p8 = por %p3064_p7, %p3063_p6 }
  0xa3   :  { %p3066_p9 = pnand %p3065_p8, %p3059_p5 }
  0xa5   :  { %3069 = shalt.err (!%p3066_p9)
}
  0xa6   :  { %146 = dma.hbm_to_vmem [thread:$0]  %s4098_s11, 3072, %s141_s25, [#allocation18], %s3107_s18, %s3107_s18, %s3108_s19  }
  0xa7   :  { %3092 = dma.done.wait [#allocation3], 128  }
  0xa8   :  { %3093 = vsyncadd [#allocation3], 4294967168 }
  0xa9   :  { %3094 = dma.done.wait [#allocation6], 4096  }
  0xaa   :  { %3095 = vsyncadd [#allocation6], 4294963200 }
  0xab   :  { %3096 = dma.done.wait [#allocation9], 7168  }
  0xac   :  { %3097 = vsyncadd [#allocation9], 4294960128 }
  0xad   :  { %3098 = dma.done.wait [#allocation12], 4096  }
  0xae   :  { %3099 = vsyncadd [#allocation12], 4294963200 }
  0xaf   :  { %3100 = dma.done.wait [#allocation15], 2048  }
  0xb0   :  { %3101 = vsyncadd [#allocation15], 4294965248 }
  0xb1   :  { %3102 = dma.done.wait [#allocation18], 3072  }
  0xb2   :  { %3103 = vsyncadd [#allocation18], 4294964224  ;;  %v4101_v0 = vmov 0.0   ;;  %v2444_v1 = vld [vmem:[#allocation5 + $0x40] sm:$0xff]   ;;  %v2445_v15 = vld [vmem:[#allocation5 + $0x48] sm:$0xff]   ;;  %vm3119_vm0 = vmmov 0  }
  0xb3   :  { %2702 = vmatprep.subr.bf16.mxu1 %v4101_v0  ;;  %v2459_v2 = vld [vmem:[#allocation7 + $0x40] sm:$0xff]   ;;  %v3339_v4 = vunpack.c.l.bf16 %v2444_v1  ;;  %v3341_v5 = vunpack.c.h.bf16 %v2444_v1  ;;  %v2460_v16 = vld [vmem:[#allocation7 + $0x48] sm:$0xff]   ;;  %v3357_v24 = vunpack.c.l.bf16 %v2445_v15  ;;  %v3359_v25 = vunpack.c.h.bf16 %v2445_v15  ;;  %v2446_v41 = vld [vmem:[#allocation5 + $0x50] sm:$0xff]   ;;  %s3120_s25 = smov [#allocation19]  }
  0xb4   :  { %v2502_v3 = vld [vmem:[#allocation8 + $0x40] sm:$0xff]   ;;  %v3343_v6 = vunpack.c.l.bf16 %v2459_v2  ;;  %v3345_v7 = vunpack.c.h.bf16 %v2459_v2  ;;  %v2503_v21 = vld [vmem:[#allocation8 + $0x48] sm:$0xff]   ;;  %v3363_v29 = vunpack.c.l.bf16 %v2460_v16  ;;  %v3365_v30 = vunpack.c.h.bf16 %v2460_v16  ;;  %v2461_v46 = vld [vmem:[#allocation7 + $0x50] sm:$0xff]   ;;  %s1766_s29 = sshll.u32 %s3120_s25, 4  ;;  %s1767_s29 = int_to_ptr.vmem [resolvable:$true] %s1766_s29 }
  0xb5   :  { %v1798_v8 = vld [vmem:[#allocation5] sm:$0xff]   ;;  %v2087_v11 = vunpack.c.l.bf16 %v2502_v3  ;;  %v2088_v12 = vunpack.c.h.bf16 %v2502_v3  ;;  %v2437_v26 = vld [vmem:[#allocation5 + $0x8] sm:$0xff]   ;;  %v2091_v34 = vunpack.c.l.bf16 %v2503_v21  ;;  %v2092_v35 = vunpack.c.h.bf16 %v2503_v21  ;;  %v2504_v51 = vld [vmem:[#allocation8 + $0x50] sm:$0xff]   ;;  %s3070_s30 = scalar_lea.vmem %s1767_s29, 128  ;;  %p3075_p11 = scmp.lt.s32.totalorder %s1767_s29, %s1767_s29 }
  0xb6   :  { %v1862_v9 = vld [vmem:[#allocation7] sm:$0xff]   ;;  %v3347_v13 = vunpack.c.l.bf16 %v1798_v8  ;;  %v3349_v14 = vunpack.c.h.bf16 %v1798_v8  ;;  %v2452_v31 = vld [vmem:[#allocation7 + $0x8] sm:$0xff]   ;;  %v3371_v39 = vunpack.c.l.bf16 %v2437_v26  ;;  %v3373_v40 = vunpack.c.h.bf16 %v2437_v26  ;;  %v2438_v52 = vld [vmem:[#allocation5 + $0x10] sm:$0xff]   ;;  %p3071_p10 = scmp.ne.s32.totalorder %s1767_s29, %s3070_s30  ;;  %p3076_p12 = scmp.lt.s32.totalorder %s3070_s30, %s3070_s30 }
  0xb7   :  { %v2054_v10 = vld [vmem:[#allocation8] sm:$0xff]   ;;  %v3351_v17 = vunpack.c.l.bf16 %v1862_v9  ;;  %v3353_v18 = vunpack.c.h.bf16 %v1862_v9  ;;  %v517_v22 = vmul.f32 %v2087_v11, %v3343_v6  ;;  %v518_v23 = vmul.f32 %v2088_v12, %v3345_v7  ;;  %v2495_v36 = vld [vmem:[#allocation8 + $0x8] sm:$0xff]   ;;  %v2453_v57 = vld [vmem:[#allocation7 + $0x10] sm:$0xff]  }
  0xb8   :  { %v2055_v19 = vunpack.c.l.bf16 %v2054_v10  ;;  %v2056_v20 = vunpack.c.h.bf16 %v2054_v10  ;;  %v519_v43 = vmul.f32 %v2091_v34, %v3363_v29  ;;  %v520_v44 = vmul.f32 %v2092_v35, %v3365_v30  ;;  %v2496_v62 = vld [vmem:[#allocation8 + $0x10] sm:$0xff]   ;;  %v2447_v8 = vld [vmem:[#allocation5 + $0x58] sm:$0xff]   ;;  %p3077_p13 = por %p3076_p12, %p3075_p11 }
  0xb9   :  { %v549_v32 = vadd.f32 %v3339_v4, %v517_v22  ;;  %v550_v33 = vadd.f32 %v3341_v5, %v518_v23  ;;  %v3377_v45 = vunpack.c.l.bf16 %v2452_v31  ;;  %v3379_v48 = vunpack.c.h.bf16 %v2452_v31  ;;  %v2462_v15 = vld [vmem:[#allocation7 + $0x58] sm:$0xff]  }
  0xba   :  { %v501_v27 = vmul.f32 %v2055_v19, %v3351_v17  ;;  %v502_v28 = vmul.f32 %v2056_v20, %v3353_v18  ;;  %v2059_v49 = vunpack.c.l.bf16 %v2495_v36  ;;  %v2060_v50 = vunpack.c.h.bf16 %v2495_v36  ;;  %v2505_v22 = vld [vmem:[#allocation8 + $0x58] sm:$0xff]   ;;  %p3078_p0 = pnand %p3077_p13, %p3071_p10 }
  0xbb   :  { %v573_v42 = vpack.c.bf16 %v550_v33, %v549_v32  ;;  %v551_v53 = vadd.f32 %v3357_v24, %v519_v43  ;;  %v552_v54 = vadd.f32 %v3359_v25, %v520_v44  ;;  %v3383_v55 = vunpack.c.l.bf16 %v2446_v41  ;;  %v2439_v31 = vld [vmem:[#allocation5 + $0x18] sm:$0xff]   ;;  %v2448_v44 = vld [vmem:[#allocation5 + $0x60] sm:$0xff]  }
  0xbc   :  { %v533_v37 = vadd.f32 %v3347_v13, %v501_v27  ;;  %v534_v38 = vadd.f32 %v3349_v14, %v502_v28  ;;  %v3385_v56 = vunpack.c.h.bf16 %v2446_v41  ;;  %v503_v58 = vmul.f32 %v2059_v49, %v3377_v45  ;;  %v2454_v36 = vld [vmem:[#allocation7 + $0x18] sm:$0xff]  }
  0xbd   :  { %2582 = vmatprep.subr.bf16.mxu0 %v573_v42  ;;  %v504_v59 = vmul.f32 %v2060_v50, %v3379_v48  ;;  %v3389_v60 = vunpack.c.l.bf16 %v2461_v46  ;;  %v3391_v61 = vunpack.c.h.bf16 %v2461_v46  ;;  %v574_v63 = vpack.c.bf16 %v552_v54, %v551_v53  ;;  %v2497_v43 = vld [vmem:[#allocation8 + $0x18] sm:$0xff]  }
  0xbe   :  { %v565_v47 = vpack.c.bf16 %v534_v38, %v533_v37  ;;  %v2095_v1 = vunpack.c.l.bf16 %v2504_v51  ;;  %v2096_v2 = vunpack.c.h.bf16 %v2504_v51  ;;  %v3393_v3 = vunpack.c.l.bf16 %v2438_v52 }
  0xbf   :  { %4285 = vst [vmem:[#allocation27_spill] sm:$0xff] %v3391_v61  ;;  %v535_v9 = vadd.f32 %v3371_v39, %v503_v58  ;;  %v536_v10 = vadd.f32 %v3373_v40, %v504_v59  ;;  %v3397_v11 = vunpack.c.h.bf16 %v2438_v52  ;;  %v3399_v12 = vunpack.c.l.bf16 %v2453_v57 }
  0xc0   :  { %2583 = vmatpush3.bf16.msra.mxu0 %v565_v47  ;;  %v521_v16 = vmul.f32 %v2095_v1, %v3389_v60  ;;  %v522_v19 = vmul.f32 %v2096_v2, %v3391_v61  ;;  %v3403_v20 = vunpack.c.h.bf16 %v2453_v57  ;;  %v2063_v21 = vunpack.c.l.bf16 %v2496_v62  ;;  %v2463_v57 = vld [vmem:[#allocation7 + $0x60] sm:$0xff]  }
  0xc1   :  { %2584 = vmatprep.subr.bf16.mxu0 %v574_v63  ;;  %v566_v23 = vpack.c.bf16 %v536_v10, %v535_v9  ;;  %v2064_v26 = vunpack.c.h.bf16 %v2496_v62  ;;  %v3405_v27 = vunpack.c.l.bf16 %v2447_v8  ;;  %v3407_v28 = vunpack.c.h.bf16 %v2447_v8  ;;  %v2506_v1 = vld [vmem:[#allocation8 + $0x60] sm:$0xff]  }
  0xc2   :  { %v553_v32 = vadd.f32 %v3383_v55, %v521_v16  ;;  %v554_v33 = vadd.f32 %v3385_v56, %v522_v19  ;;  %v505_v34 = vmul.f32 %v2063_v21, %v3399_v12  ;;  %v3412_v35 = vunpack.c.l.bf16 %v2462_v15  ;;  %v2440_v2 = vld [vmem:[#allocation5 + $0x20] sm:$0xff]  }
  0xc3   :  { %4286 = vst [vmem:[#allocation28_spill] sm:$0xff] %v3405_v27  ;;  %4287 = vst [vmem:[#allocation29_spill] sm:$0xff] %v3407_v28  ;;  %v506_v37 = vmul.f32 %v2064_v26, %v3403_v20  ;;  %v3415_v38 = vunpack.c.h.bf16 %v2462_v15  ;;  %v2099_v41 = vunpack.c.l.bf16 %v2505_v22  ;;  %v2100_v42 = vunpack.c.h.bf16 %v2505_v22  ;;  %v2455_v16 = vld [vmem:[#allocation7 + $0x20] sm:$0xff]  }
  0xc4   :  { %2585 = vmatpush3.bf16.msra.mxu0 %v566_v23  ;;  %v575_v46 = vpack.c.bf16 %v554_v33, %v553_v32  ;;  %v537_v47 = vadd.f32 %v3393_v3, %v505_v34  ;;  %v3418_v49 = vunpack.c.l.bf16 %v2439_v31  ;;  %v3420_v50 = vunpack.c.h.bf16 %v2439_v31  ;;  %v2498_v26 = vld [vmem:[#allocation8 + $0x20] sm:$0xff]  }
  0xc5   :  { %v538_v51 = vadd.f32 %v3397_v11, %v506_v37  ;;  %v523_v52 = vmul.f32 %v2099_v41, %v3412_v35  ;;  %v524_v53 = vmul.f32 %v2100_v42, %v3415_v38  ;;  %v3425_v54 = vunpack.c.l.bf16 %v2454_v36 }
  0xc6   :  { %4288 = vst [vmem:[#allocation30_spill] sm:$0xff] %v3418_v49  ;;  %4289 = vst [vmem:[#allocation31_spill] sm:$0xff] %v3420_v50  ;;  %2586 = vmatprep.subr.bf16.mxu0 %v575_v46  ;;  %v3427_v58 = vunpack.c.h.bf16 %v2454_v36  ;;  %v2067_v59 = vunpack.c.l.bf16 %v2497_v43  ;;  %v2068_v62 = vunpack.c.h.bf16 %v2497_v43  ;;  %v3429_v63 = vunpack.c.l.bf16 %v2448_v44  ;;  %v2449_v36 = vld [vmem:[#allocation5 + $0x68] sm:$0xff]  }
  0xc7   :  { %v567_v8 = vpack.c.bf16 %v538_v51, %v537_v47  ;;  %v555_v9 = vadd.f32 %v3405_v27, %v523_v52  ;;  %v556_v10 = vadd.f32 %v3407_v28, %v524_v53  ;;  %v3433_v15 = vunpack.c.h.bf16 %v2448_v44  ;;  %v2464_v44 = vld [vmem:[#allocation7 + $0x68] sm:$0xff]  }
  0xc8   :  { %4290 = vst [vmem:[#allocation32_spill] sm:$0xff] %v3429_v63  ;;  %v507_v19 = vmul.f32 %v2067_v59, %v3425_v54  ;;  %v508_v21 = vmul.f32 %v2068_v62, %v3427_v58  ;;  %v3437_v22 = vunpack.c.l.bf16 %v2463_v57  ;;  %v3439_v23 = vunpack.c.h.bf16 %v2463_v57  ;;  %v2507_v53 = vld [vmem:[#allocation8 + $0x68] sm:$0xff]  }
  0xc9   :  { %4291 = vst [vmem:[#allocation33_spill] sm:$0xff] %v3433_v15  ;;  %2587 = vmatpush3.bf16.msra.mxu0 %v567_v8  ;;  %v576_v31 = vpack.c.bf16 %v556_v10, %v555_v9  ;;  %v2103_v32 = vunpack.c.l.bf16 %v2506_v1  ;;  %v2104_v33 = vunpack.c.h.bf16 %v2506_v1  ;;  %v3441_v34 = vunpack.c.l.bf16 %v2440_v2 }
  0xca   :  { %4292 = vst [vmem:[#allocation34_spill] sm:$0xff] %v3439_v23  ;;  %v539_v37 = vadd.f32 %v3418_v49, %v507_v19  ;;  %v540_v41 = vadd.f32 %v3420_v50, %v508_v21  ;;  %v3445_v42 = vunpack.c.h.bf16 %v2440_v2  ;;  %v3447_v43 = vunpack.c.l.bf16 %v2455_v16  ;;  %v2441_v2 = vld [vmem:[#allocation5 + $0x28] sm:$0xff]  }
  0xcb   :  { %4293 = vst [vmem:[#allocation35_spill] sm:$0xff] %v3441_v34  ;;  %2588 = vmatprep.subr.bf16.mxu0 %v576_v31  ;;  %v525_v46 = vmul.f32 %v2103_v32, %v3437_v22  ;;  %v526_v47 = vmul.f32 %v2104_v33, %v3439_v23  ;;  %v3451_v51 = vunpack.c.h.bf16 %v2455_v16  ;;  %v2071_v52 = vunpack.c.l.bf16 %v2498_v26  ;;  %v2456_v21 = vld [vmem:[#allocation7 + $0x28] sm:$0xff]  }
  0xcc   :  { %4294 = vst [vmem:[#allocation36_spill] sm:$0xff] %v3445_v42  ;;  %4295 = vst [vmem:[#allocation37_spill] sm:$0xff] %v3447_v43  ;;  %v568_v57 = vpack.c.bf16 %v540_v41, %v539_v37  ;;  %v2072_v59 = vunpack.c.h.bf16 %v2498_v26  ;;  %v3453_v62 = vunpack.c.l.bf16 %v2449_v36  ;;  %v3455_v1 = vunpack.c.h.bf16 %v2449_v36  ;;  %v2499_v33 = vld [vmem:[#allocation8 + $0x28] sm:$0xff]   ;;  %v2450_v36 = vld [vmem:[#allocation5 + $0x70] sm:$0xff]  }
  0xcd   :  { %4296 = vst [vmem:[#allocation38_spill] sm:$0xff] %v3451_v51  ;;  %v557_v8 = vadd.f32 %v3429_v63, %v525_v46  ;;  %v558_v9 = vadd.f32 %v3433_v15, %v526_v47  ;;  %v509_v10 = vmul.f32 %v2071_v52, %v3447_v43  ;;  %v3460_v19 = vunpack.c.l.bf16 %v2464_v44 }
  0xce   :  { %4297 = vst [vmem:[#allocation39_spill] sm:$0xff] %v3453_v62  ;;  %4298 = vst [vmem:[#allocation40_spill] sm:$0xff] %v3455_v1  ;;  %2589 = vmatpush3.bf16.msra.mxu0 %v568_v57  ;;  %v510_v16 = vmul.f32 %v2072_v59, %v3451_v51  ;;  %v3463_v31 = vunpack.c.h.bf16 %v2464_v44  ;;  %v2107_v26 = vunpack.c.l.bf16 %v2507_v53  ;;  %v2108_v32 = vunpack.c.h.bf16 %v2507_v53  ;;  %v2465_v44 = vld [vmem:[#allocation7 + $0x70] sm:$0xff]  }
  0xcf   :  { %4299 = vst [vmem:[#allocation41_spill] sm:$0xff] %v3460_v19  ;;  %v577_v37 = vpack.c.bf16 %v558_v9, %v557_v8  ;;  %v541_v41 = vadd.f32 %v3441_v34, %v509_v10  ;;  %v3466_v46 = vunpack.c.l.bf16 %v2441_v2  ;;  %v3468_v47 = vunpack.c.h.bf16 %v2441_v2  ;;  %v2508_v10 = vld [vmem:[#allocation8 + $0x70] sm:$0xff]  }
  0xd0   :  { %4300 = vst [vmem:[#allocation42_spill] sm:$0xff] %v3463_v31  ;;  %v542_v52 = vadd.f32 %v3445_v42, %v510_v16  ;;  %v527_v0 = vmul.f32 %v2107_v26, %v3460_v19  ;;  %v528_v57 = vmul.f32 %v2108_v32, %v3463_v31  ;;  %v3473_v59 = vunpack.c.l.bf16 %v2456_v21  ;;  %v2442_v34 = vld [vmem:[#allocation5 + $0x30] sm:$0xff]  }
  0xd1   :  { %4301 = vst [vmem:[#allocation43_spill] sm:$0xff] %v3466_v46  ;;  %4302 = vst [vmem:[#allocation44_spill] sm:$0xff] %v3468_v47  ;;  %2590 = vmatprep.subr.bf16.mxu0 %v577_v37  ;;  %v3475_v53 = vunpack.c.h.bf16 %v2456_v21  ;;  %v2075_v15 = vunpack.c.l.bf16 %v2499_v33  ;;  %v2076_v8 = vunpack.c.h.bf16 %v2499_v33  ;;  %v3477_v9 = vunpack.c.l.bf16 %v2450_v36  ;;  %v2457_v32 = vld [vmem:[#allocation7 + $0x30] sm:$0xff]  }
  0xd2   :  { %4303 = vst [vmem:[#allocation45_spill] sm:$0xff] %v3473_v59  ;;  %v569_v2 = vpack.c.bf16 %v542_v52, %v541_v41  ;;  %v559_v63 = vadd.f32 %v3453_v62, %v527_v0  ;;  %v560_v16 = vadd.f32 %v3455_v1, %v528_v57  ;;  %v3481_v26 = vunpack.c.h.bf16 %v2450_v36  ;;  %v2500_v33 = vld [vmem:[#allocation8 + $0x30] sm:$0xff]   ;;  %v2451_v0 = vld [vmem:[#allocation5 + $0x78] sm:$0xff]  }
  0xd3   :  { %4304 = vst [vmem:[#allocation46_spill] sm:$0xff] %v3475_v53  ;;  %4305 = vst [vmem:[#allocation47_spill] sm:$0xff] %v3477_v9  ;;  %v511_v42 = vmul.f32 %v2075_v15, %v3473_v59  ;;  %v512_v37 = vmul.f32 %v2076_v8, %v3475_v53  ;;  %v3485_v21 = vunpack.c.l.bf16 %v2465_v44  ;;  %v3487_v31 = vunpack.c.h.bf16 %v2465_v44  ;;  %v2466_v8 = vld [vmem:[#allocation7 + $0x78] sm:$0xff]  }
  0xd4   :  { %4306 = vst [vmem:[#allocation48_spill] sm:$0xff] %v3481_v26  ;;  %2591 = vmatpush3.bf16.msra.mxu0 %v569_v2  ;;  %v578_v19 = vpack.c.bf16 %v560_v16, %v559_v63  ;;  %v2111_v51 = vunpack.c.l.bf16 %v2508_v10  ;;  %v2112_v41 = vunpack.c.h.bf16 %v2508_v10  ;;  %v3489_v52 = vunpack.c.l.bf16 %v2442_v34  ;;  %v2509_v16 = vld [vmem:[#allocation8 + $0x78] sm:$0xff]  }
  0xd5   :  { %4307 = vst [vmem:[#allocation49_spill] sm:$0xff] %v3485_v21  ;;  %4308 = vst [vmem:[#allocation50_spill] sm:$0xff] %v3487_v31  ;;  %v543_v36 = vadd.f32 %v3466_v46, %v511_v42  ;;  %v544_v57 = vadd.f32 %v3468_v47, %v512_v37  ;;  %v3493_v1 = vunpack.c.h.bf16 %v2442_v34  ;;  %v3495_v15 = vunpack.c.l.bf16 %v2457_v32  ;;  %v2443_v34 = vld [vmem:[#allocation5 + $0x38] sm:$0xff]  }
  0xd6   :  { %4309 = vst [vmem:[#allocation51_spill] sm:$0xff] %v3489_v52  ;;  %2592 = vmatprep.subr.bf16.mxu0 %v578_v19  ;;  %v529_v44 = vmul.f32 %v2111_v51, %v3485_v21  ;;  %v530_v2 = vmul.f32 %v2112_v41, %v3487_v31  ;;  %v3499_v63 = vunpack.c.h.bf16 %v2457_v32  ;;  %v2079_v10 = vunpack.c.l.bf16 %v2500_v33  ;;  %v2458_v41 = vld [vmem:[#allocation7 + $0x38] sm:$0xff]  }
  0xd7   :  { %4310 = vst [vmem:[#allocation52_spill] sm:$0xff] %v3493_v1  ;;  %4311 = vst [vmem:[#allocation53_spill] sm:$0xff] %v3495_v15  ;;  %v570_v62 = vpack.c.bf16 %v544_v57, %v543_v36  ;;  %v2080_v53 = vunpack.c.h.bf16 %v2500_v33  ;;  %v3501_v59 = vunpack.c.l.bf16 %v2451_v0  ;;  %v3503_v42 = vunpack.c.h.bf16 %v2451_v0  ;;  %v2501_v57 = vld [vmem:[#allocation8 + $0x38] sm:$0xff]  }
  0xd8   :  { %4312 = vst [vmem:[#allocation54_spill] sm:$0xff] %v3499_v63  ;;  %v561_v37 = vadd.f32 %v3477_v9, %v529_v44  ;;  %v562_v47 = vadd.f32 %v3481_v26, %v530_v2  ;;  %v513_v19 = vmul.f32 %v2079_v10, %v3495_v15  ;;  %v3508_v51 = vunpack.c.l.bf16 %v2466_v8  ;;  %v180_v0 = vld [vmem:[#allocation2] sm:$0xff] }
  0xd9   :  { %4313 = vst [vmem:[#allocation55_spill] sm:$0xff] %v3501_v59  ;;  %4314 = vst [vmem:[#allocation56_spill] sm:$0xff] %v3503_v42  ;;  %2593 = vmatpush3.bf16.msra.mxu0 %v570_v62  ;;  %v514_v32 = vmul.f32 %v2080_v53, %v3499_v63  ;;  %v3511_v46 = vunpack.c.h.bf16 %v2466_v8  ;;  %v2115_v33 = vunpack.c.l.bf16 %v2509_v16  ;;  %v2116_v36 = vunpack.c.h.bf16 %v2509_v16  ;;  %v1926_v8 = vld [vmem:[#allocation10] sm:$0xff]  }
  0xda   :  { %4315 = vst [vmem:[#allocation57_spill] sm:$0xff] %v3508_v51  ;;  %v579_v31 = vpack.c.bf16 %v562_v47, %v561_v37  ;;  %v545_v21 = vadd.f32 %v3489_v52, %v513_v19  ;;  %v3514_v44 = vunpack.c.l.bf16 %v2443_v34  ;;  %v3516_v2 = vunpack.c.h.bf16 %v2443_v34  ;;  %v1958_v19 = vld [vmem:[#allocation11] sm:$0xff]  }
  0xdb   :  { %4316 = vst [vmem:[#allocation58_spill] sm:$0xff] %v3511_v46  ;;  %v546_v10 = vadd.f32 %v3493_v1, %v514_v32  ;;  %v531_v26 = vmul.f32 %v2115_v33, %v3508_v51  ;;  %v532_v62 = vmul.f32 %v2116_v36, %v3511_v46  ;;  %v3521_v53 = vunpack.c.l.bf16 %v2458_v41  ;;  %v2118_v52 = vld [vmem:[#allocation13] sm:$0xff]   ;;  %v2467_v33 = vld [vmem:[#allocation10 + $0x8] sm:$0xff]  }
  0xdc   :  { %4317 = vst [vmem:[#allocation59_spill] sm:$0xff] %v3514_v44  ;;  %4318 = vst [vmem:[#allocation60_spill] sm:$0xff] %v3516_v2  ;;  %2594 = vmatprep.subr.bf16.mxu0 %v579_v31  ;;  %v3523_v16 = vunpack.c.h.bf16 %v2458_v41  ;;  %v2083_v9 = vunpack.c.l.bf16 %v2501_v57  ;;  %v2084_v47 = vunpack.c.h.bf16 %v2501_v57  ;;  %v3525_v37 = vcombine.high %v180_v0, %v180_v0  ;;  %v2474_v57 = vld [vmem:[#allocation11 + $0x8] sm:$0xff]  }
  0xdd   :  { %4319 = vst [vmem:[#allocation61_spill] sm:$0xff] %v3521_v53  ;;  %v571_v34 = vpack.c.bf16 %v546_v10, %v545_v21  ;;  %v563_v63 = vadd.f32 %v3501_v59, %v531_v26  ;;  %v564_v32 = vadd.f32 %v3503_v42, %v532_v62  ;;  %v3532_v31 = vunpack.c.l.bf16 %v1926_v8  ;;  %v2510_v10 = vld [vmem:[#allocation13 + $0x8] sm:$0xff]   ;;  %v2468_v59 = vld [vmem:[#allocation10 + $0x10] sm:$0xff]  }
  0xde   :  { %4320 = vst [vmem:[#allocation62_spill] sm:$0xff] %v3523_v16  ;;  %4321 = vst [vmem:[#allocation63_spill] sm:$0xff] %v3525_v37  ;;  %v515_v36 = vmul.f32 %v2083_v9, %v3521_v53  ;;  %v516_v1 = vmul.f32 %v2084_v47, %v3523_v16  ;;  %627 = vmatprep.mubr.bf16.mxu0 %v3525_v37  ;;  %v3534_v41 = vunpack.c.h.bf16 %v1926_v8  ;;  %v3536_v51 = vunpack.c.l.bf16 %v1958_v19  ;;  %v2475_v16 = vld [vmem:[#allocation11 + $0x10] sm:$0xff]  }
  0xdf   :  { %4322 = vst [vmem:[#allocation64_spill] sm:$0xff] %v3532_v31  ;;  %2595 = vmatpush3.bf16.msra.mxu0 %v571_v34  ;;  %v580_v46 = vpack.c.bf16 %v564_v32, %v563_v63  ;;  %v3538_v21 = vunpack.c.h.bf16 %v1958_v19  ;;  %v2119_v26 = vunpack.c.l.bf16 %v2118_v52  ;;  %v2120_v47 = vunpack.c.h.bf16 %v2118_v52  ;;  %v2469_v52 = vld [vmem:[#allocation10 + $0x18] sm:$0xff]  }
  0xe0   :  { %4323 = vst [vmem:[#allocation65_spill] sm:$0xff] %v3534_v41  ;;  %4324 = vst [vmem:[#allocation66_spill] sm:$0xff] %v3536_v51  ;;  %v547_v62 = vadd.f32 %v3514_v44, %v515_v36  ;;  %v548_v9 = vadd.f32 %v3516_v2, %v516_v1  ;;  %v3542_v42 = vunpack.c.l.bf16 %v2467_v33  ;;  %v3545_v34 = vunpack.c.h.bf16 %v2467_v33  ;;  %v2511_v1 = vld [vmem:[#allocation13 + $0x10] sm:$0xff]   ;;  %v2476_v33 = vld [vmem:[#allocation11 + $0x18] sm:$0xff]  }
  0xe1   :  { %4325 = vst [vmem:[#allocation67_spill] sm:$0xff] %v3538_v21  ;;  %2596 = vmatprep.subr.bf16.mxu0 %v580_v46  ;;  %v669_v8 = vmul.f32 %v2119_v26, %v3536_v51  ;;  %v3547_v63 = vunpack.c.l.bf16 %v2474_v57  ;;  %v3549_v19 = vunpack.c.h.bf16 %v2474_v57  ;;  %v670_v53 = vmul.f32 %v2120_v47, %v3538_v21 }
  0xe2   :  { %4326 = vst [vmem:[#allocation68_spill] sm:$0xff] %v3542_v42  ;;  %4327 = vst [vmem:[#allocation69_spill] sm:$0xff] %v3545_v34  ;;  %v572_v32 = vpack.c.bf16 %v548_v9, %v547_v62  ;;  %v2123_v36 = vunpack.c.l.bf16 %v2510_v10  ;;  %v2124_v44 = vunpack.c.h.bf16 %v2510_v10  ;;  %v3552_v2 = vcombine.low %v180_v0, %v180_v0  ;;  %v2512_v10 = vld [vmem:[#allocation13 + $0x18] sm:$0xff]  }
  0xe3   :  { %4328 = vst [vmem:[#allocation70_spill] sm:$0xff] %v3547_v63  ;;  %4329 = vst [vmem:[#allocation71_spill] sm:$0xff] %v3549_v19  ;;  %v685_v15 = vadd.f32 %v3532_v31, %v669_v8  ;;  %v3555_v46 = vunpack.c.l.bf16 %v2468_v59  ;;  %v3557_v26 = vunpack.c.l.bf16 %v2475_v16  ;;  %v686_v57 = vadd.f32 %v3534_v41, %v670_v53 }
  0xe4   :  { %4330 = vst [vmem:[#allocation72_spill] sm:$0xff] %v3552_v2  ;;  %2597 = vmatpush3.bf16.msra.mxu0 %v572_v32  ;;  %v671_v62 = vmul.f32 %v2123_v36, %v3547_v63  ;;  %v672_v9 = vmul.f32 %v2124_v44, %v3549_v19  ;;  %v3562_v47 = vunpack.c.h.bf16 %v2475_v16  ;;  %v3564_v21 = vunpack.c.h.bf16 %v2468_v59  ;;  %v2477_v36 = vld [vmem:[#allocation11 + $0x20] sm:$0xff]  }
  0xe5   :  { %4331 = vst [vmem:[#allocation73_spill] sm:$0xff] %v3555_v46  ;;  %4332 = vst [vmem:[#allocation74_spill] sm:$0xff] %v3557_v26  ;;  %v2127_v0 = vunpack.c.l.bf16 %v2511_v1  ;;  %v2128_v51 = vunpack.c.h.bf16 %v2511_v1  ;;  %v3566_v8 = vunpack.c.l.bf16 %v2469_v52  ;;  %v4336_v31 = vmov 0.0   ;;  %v2513_v19 = vld [vmem:[#allocation13 + $0x20] sm:$0xff]  }
  0xe6   :  { %4333 = vst [vmem:[#allocation75_spill] sm:$0xff] %v3562_v47  ;;  %4334 = vst [vmem:[#allocation76_spill] sm:$0xff] %v3564_v21  ;;  %2722 = vmatprep.subr.bf16.mxu0 %v4336_v31  ;;  %v701_v43 = vpack.c.bf16 %v686_v57, %v685_v15  ;;  %v687_v32 = vadd.f32 %v3542_v42, %v671_v62  ;;  %v688_v53 = vadd.f32 %v3545_v34, %v672_v9  ;;  %v2470_v62 = vld [vmem:[#allocation10 + $0x20] sm:$0xff]  }
  0xe7   :  { %4335 = vst [vmem:[#allocation77_spill] sm:$0xff] %v3566_v8  ;;  %v3571_v41 = vunpack.c.l.bf16 %v2476_v33  ;;  %628 = vmatmul.mubr.bf16.vlgmr.msra.gmra.mrb[0].mxu0 %v3552_v2  ;;  %v673_v44 = vmul.f32 %v2127_v0, %v3557_v26  ;;  %v674_v59 = vmul.f32 %v2128_v51, %v3562_v47  ;;  %v3576_v16 = vunpack.c.h.bf16 %v2476_v33  ;;  %v2478_v51 = vld [vmem:[#allocation11 + $0x28] sm:$0xff]   ;;  %2718 = vmatprep.mubr.msk.bf16.mxu1 %vm3119_vm0, %v4336_v31 }
  0xe8   :  { %v2131_v1 = vunpack.c.l.bf16 %v2512_v10  ;;  %2703 = vmatpush3.bf16.msra.mxu1 %v701_v43  ;;  %v702_v63 = vpack.c.bf16 %v688_v53, %v687_v32  ;;  %v3578_v15 = vunpack.c.h.bf16 %v2469_v52  ;;  %v2132_v57 = vunpack.c.h.bf16 %v2512_v10  ;;  %v2514_v32 = vld [vmem:[#allocation13 + $0x28] sm:$0xff]   ;;  %2738 = vmatprep.mubr.msk.bf16.mxu0 %vm3119_vm0, %v4336_v31 }
  0xe9   :  { %4337 = vst [vmem:[#allocation78_spill] sm:$0xff] %v3571_v41  ;;  %4338 = vst [vmem:[#allocation79_spill] sm:$0xff] %v3576_v16  ;;  %2704 = vmatprep.subr.bf16.mxu1 %v4336_v31  ;;  %v689_v9 = vadd.f32 %v3555_v46, %v673_v44  ;;  %v690_v34 = vadd.f32 %v3564_v21, %v674_v59  ;;  %v3584_v26 = vunpack.c.l.bf16 %v2477_v36  ;;  %v3587_v47 = vunpack.c.h.bf16 %v2477_v36 }
  0xea   :  { %4339 = vst [vmem:[#allocation80_spill] sm:$0xff] %v3578_v15  ;;  %v675_v0 = vmul.f32 %v2131_v1, %v3571_v41  ;;  %v676_v33 = vmul.f32 %v2132_v57, %v3576_v16  ;;  %v2135_v43 = vunpack.c.l.bf16 %v2513_v19  ;;  %v2136_v52 = vunpack.c.h.bf16 %v2513_v19  ;;  %v2471_v57 = vld [vmem:[#allocation10 + $0x28] sm:$0xff]   ;;  %v2490_v16 = vld [vmem:[#allocation16 + $0x18] sm:$0xff]  }
  0xeb   :  { %4340 = vst [vmem:[#allocation81_spill] sm:$0xff] %v3584_v26  ;;  %4341 = vst [vmem:[#allocation82_spill] sm:$0xff] %v3587_v47  ;;  %v703_v10 = vpack.c.bf16 %v690_v34, %v689_v9  ;;  %v3590_v42 = vunpack.c.l.bf16 %v2470_v62  ;;  %v3592_v44 = vunpack.c.h.bf16 %v2470_v62  ;;  %v3597_v36 = vunpack.c.l.bf16 %v2478_v51 }
  0xec   :  { %v691_v53 = vadd.f32 %v3566_v8, %v675_v0  ;;  %2705 = vmatpush3.bf16.msra.mxu1 %v702_v63  ;;  %v692_v59 = vadd.f32 %v3578_v15, %v676_v33  ;;  %v677_v1 = vmul.f32 %v2135_v43, %v3584_v26  ;;  %v678_v21 = vmul.f32 %v2136_v52, %v3587_v47  ;;  %v2483_v47 = vld [vmem:[#allocation14 + $0x18] sm:$0xff]  }
  0xed   :  { %4342 = vst [vmem:[#allocation83_spill] sm:$0xff] %v3590_v42  ;;  %4343 = vst [vmem:[#allocation84_spill] sm:$0xff] %v3592_v44  ;;  %2706 = vmatprep.subr.bf16.mxu1 %v4336_v31  ;;  %v3600_v19 = vunpack.c.h.bf16 %v2478_v51  ;;  %v2139_v34 = vunpack.c.l.bf16 %v2514_v32  ;;  %v2140_v9 = vunpack.c.h.bf16 %v2514_v32  ;;  %v3602_v8 = vunpack.c.l.bf16 %v2471_v57 }
  0xee   :  { %4344 = vst [vmem:[#allocation85_spill] sm:$0xff] %v3597_v36  ;;  %v704_v0 = vpack.c.bf16 %v692_v59, %v691_v53  ;;  %v3604_v62 = vunpack.c.h.bf16 %v2471_v57  ;;  %v693_v63 = vadd.f32 %v3590_v42, %v677_v1  ;;  %v694_v33 = vadd.f32 %v3592_v44, %v678_v21  ;;  %v2479_v21 = vld [vmem:[#allocation11 + $0x30] sm:$0xff]  }
  0xef   :  { %4345 = vst [vmem:[#allocation86_spill] sm:$0xff] %v3600_v19  ;;  %4346 = vst [vmem:[#allocation87_spill] sm:$0xff] %v3602_v8  ;;  %v679_v43 = vmul.f32 %v2139_v34, %v3597_v36  ;;  %v680_v52 = vmul.f32 %v2140_v9, %v3600_v19  ;;  %v2515_v59 = vld [vmem:[#allocation13 + $0x30] sm:$0xff]   ;;  %v3616_v1 = vunpack.c.l.bf16 %v2479_v21  ;;  %v3618_v57 = vunpack.c.h.bf16 %v2479_v21 }
  0xf0   :  { %4347 = vst [vmem:[#allocation88_spill] sm:$0xff] %v3604_v62  ;;  %2707 = vmatpush3.bf16.msra.mxu1 %v703_v10  ;;  %v705_v51 = vpack.c.bf16 %v694_v33, %v693_v63  ;;  %v2143_v34 = vunpack.c.l.bf16 %v2515_v59  ;;  %v2144_v9 = vunpack.c.h.bf16 %v2515_v59  ;;  %v2473_v59 = vld [vmem:[#allocation10 + $0x38] sm:$0xff]   ;;  %v3681_v2 = vunpack.c.l.bf16 %v2483_v47 }
  0xf1   :  { %2708 = vmatprep.subr.bf16.mxu1 %v4336_v31  ;;  %v695_v32 = vadd.f32 %v3602_v8, %v679_v43  ;;  %v696_v53 = vadd.f32 %v3604_v62, %v680_v52  ;;  %4348 = vst [vmem:[#allocation89_spill] sm:$0xff] %v3616_v1  ;;  %4349 = vst [vmem:[#allocation90_spill] sm:$0xff] %v3618_v57  ;;  %v3634_v42 = vunpack.c.h.bf16 %v2473_v59 }
  0xf2   :  { %v681_v43 = vmul.f32 %v2143_v34, %v3616_v1  ;;  %v682_v52 = vmul.f32 %v2144_v9, %v3618_v57  ;;  %v2531_v34 = vld [vmem:[#allocation8 + $0xc0] sm:$0xff]   ;;  %v2518_v1 = vld [vmem:[#allocation17 + $0x10] sm:$0xff]   ;;  %4368 = vst [vmem:[#allocation109_spill] sm:$0xff] %v3681_v2 }
  0xf3   :  { %v706_v10 = vpack.c.bf16 %v696_v53, %v695_v32  ;;  %v2516_v32 = vld [vmem:[#allocation13 + $0x38] sm:$0xff]   ;;  %4355 = vst [vmem:[#allocation96_spill] sm:$0xff] %v3634_v42 }
  0xf4   :  { %2709 = vmatpush3.bf16.msra.mxu1 %v704_v0  ;;  %v2472_v0 = vld [vmem:[#allocation10 + $0x30] sm:$0xff]   ;;  %v2147_v8 = vunpack.c.l.bf16 %v2516_v32  ;;  %v2148_v19 = vunpack.c.h.bf16 %v2516_v32 }
  0xf5   :  { %2710 = vmatprep.subr.bf16.mxu1 %v4336_v31  ;;  %v3620_v63 = vunpack.c.l.bf16 %v2472_v0  ;;  %v3622_v33 = vunpack.c.h.bf16 %v2472_v0  ;;  %v3632_v0 = vunpack.c.l.bf16 %v2473_v59 }
  0xf7   :  { %4350 = vst [vmem:[#allocation91_spill] sm:$0xff] %v3620_v63  ;;  %4351 = vst [vmem:[#allocation92_spill] sm:$0xff] %v3622_v33  ;;  %v697_v53 = vadd.f32 %v3620_v63, %v681_v43  ;;  %v2215_v43 = vunpack.c.l.bf16 %v2531_v34  ;;  %v2216_v63 = vunpack.c.h.bf16 %v2531_v34  ;;  %v2150_v34 = vld [vmem:[#allocation17] sm:$0xff]  }
  0xf8   :  { %2711 = vmatpush3.bf16.msra.mxu1 %v705_v51  ;;  %v2480_v51 = vld [vmem:[#allocation11 + $0x38] sm:$0xff]   ;;  %4354 = vst [vmem:[#allocation95_spill] sm:$0xff] %v3632_v0 }
  0xf9   :  { %2712 = vmatprep.subr.bf16.mxu1 %v4336_v31  ;;  %v3628_v62 = vunpack.c.l.bf16 %v2480_v51  ;;  %v3630_v21 = vunpack.c.h.bf16 %v2480_v51  ;;  %v959_v32 = vmul.f32 %v2215_v43, %v3343_v6 }
  0xfb   :  { %4352 = vst [vmem:[#allocation93_spill] sm:$0xff] %v3628_v62  ;;  %4353 = vst [vmem:[#allocation94_spill] sm:$0xff] %v3630_v21  ;;  %v683_v9 = vmul.f32 %v2147_v8, %v3628_v62  ;;  %v684_v57 = vmul.f32 %v2148_v19, %v3630_v21  ;;  %v991_v59 = vadd.f32 %v3339_v4, %v959_v32  ;;  %v2488_v32 = vld [vmem:[#allocation16 + $0x8] sm:$0xff]  }
  0xfc   :  { %2713 = vmatpush3.bf16.msra.mxu1 %v706_v10  ;;  %v698_v10 = vadd.f32 %v3622_v33, %v682_v52  ;;  %v3661_v21 = vunpack.c.l.bf16 %v2488_v32  ;;  %v3663_v62 = vunpack.c.h.bf16 %v2488_v32 }
  0xfd   :  { %2714 = vmatprep.subr.bf16.mxu1 %v4336_v31  ;;  %v699_v52 = vadd.f32 %v3632_v0, %v683_v9  ;;  %v700_v51 = vadd.f32 %v3634_v42, %v684_v57  ;;  %v2022_v57 = vld [vmem:[#allocation16] sm:$0xff]   ;;  %v2482_v42 = vld [vmem:[#allocation14 + $0x10] sm:$0xff]  }
  0xfe   :  { %v707_v44 = vpack.c.bf16 %v698_v10, %v697_v53  ;;  %v960_v53 = vmul.f32 %v2216_v63, %v3345_v7  ;;  %v3653_v43 = vunpack.c.l.bf16 %v2022_v57  ;;  %v2489_v0 = vld [vmem:[#allocation16 + $0x10] sm:$0xff]   ;;  %4362 = vst [vmem:[#allocation103_spill] sm:$0xff] %v3661_v21  ;;  %4363 = vst [vmem:[#allocation104_spill] sm:$0xff] %v3663_v62  ;;  %v3667_v15 = vunpack.c.l.bf16 %v2482_v42 }
  0xff   :  { %v708_v10 = vpack.c.bf16 %v700_v51, %v699_v52  ;;  %v3655_v52 = vunpack.c.h.bf16 %v2022_v57  ;;  %v2481_v51 = vld [vmem:[#allocation14 + $0x8] sm:$0xff]   ;;  %v3673_v26 = vunpack.c.l.bf16 %v2489_v0  ;;  %v3675_v32 = vunpack.c.h.bf16 %v2489_v0 }
 0x100   :  { %2715 = vmatpush3.bf16.msra.mxu1 %v707_v44  ;;  %v992_v8 = vadd.f32 %v3341_v5, %v960_v53  ;;  %v1990_v44 = vld [vmem:[#allocation14] sm:$0xff]   ;;  %4358 = vst [vmem:[#allocation99_spill] sm:$0xff] %v3653_v43  ;;  %v2517_v53 = vld [vmem:[#allocation17 + $0x8] sm:$0xff]   ;;  %4364 = vst [vmem:[#allocation105_spill] sm:$0xff] %v3667_v15 }
 0x101   :  { %2716 = vmatprep.subr.bf16.mxu1 %v4336_v31  ;;  %v3649_v9 = vunpack.c.l.bf16 %v1990_v44  ;;  %v3651_v63 = vunpack.c.h.bf16 %v1990_v44  ;;  %4359 = vst [vmem:[#allocation100_spill] sm:$0xff] %v3655_v52  ;;  %v2155_v44 = vunpack.c.l.bf16 %v2517_v53  ;;  %v2156_v33 = vunpack.c.h.bf16 %v2517_v53  ;;  %4366 = vst [vmem:[#allocation107_spill] sm:$0xff] %v3673_v26 }
 0x102   :  { %v1015_v19 = vpack.c.bf16 %v992_v8, %v991_v59  ;;  %v2152_v59 = vunpack.c.h.bf16 %v2150_v34  ;;  %v3657_v8 = vunpack.c.l.bf16 %v2481_v51  ;;  %4367 = vst [vmem:[#allocation108_spill] sm:$0xff] %v3675_v32 }
 0x103   :  { %4356 = vst [vmem:[#allocation97_spill] sm:$0xff] %v3649_v9  ;;  %4357 = vst [vmem:[#allocation98_spill] sm:$0xff] %v3651_v63  ;;  %v793_v46 = vmul.f32 %v2156_v33, %v3663_v62  ;;  %v3685_v62 = vunpack.c.l.bf16 %v2490_v16 }
 0x104   :  { %2717 = vmatpush3.bf16.msra.mxu1 %v708_v10  ;;  %v2151_v10 = vunpack.c.l.bf16 %v2150_v34  ;;  %4360 = vst [vmem:[#allocation101_spill] sm:$0xff] %v3657_v8  ;;  %v791_v36 = vmul.f32 %v2152_v59, %v3655_v52  ;;  %v3669_v34 = vunpack.c.h.bf16 %v2482_v42  ;;  %v2160_v59 = vunpack.c.h.bf16 %v2518_v1  ;;  %v2519_v52 = vld [vmem:[#allocation17 + $0x18] sm:$0xff]  }
 0x105   :  { %2622 = vmatprep.subr.bf16.mxu1 %v1015_v19  ;;  %v3659_v19 = vunpack.c.h.bf16 %v2481_v51  ;;  %v792_v51 = vmul.f32 %v2155_v44, %v3661_v21  ;;  %4369 = vst [vmem:[#allocation110_spill] sm:$0xff] %v3685_v62  ;;  %v2491_v21 = vld [vmem:[#allocation16 + $0x20] sm:$0xff]  }
 0x106   :  { %v790_v57 = vmul.f32 %v2151_v10, %v3653_v43  ;;  %4365 = vst [vmem:[#allocation106_spill] sm:$0xff] %v3669_v34  ;;  %v807_v10 = vadd.f32 %v3651_v63, %v791_v36  ;;  %v2159_v43 = vunpack.c.l.bf16 %v2518_v1  ;;  %v795_v0 = vmul.f32 %v2160_v59, %v3675_v32 }
 0x107   :  { %4361 = vst [vmem:[#allocation102_spill] sm:$0xff] %v3659_v19  ;;  %v808_v42 = vadd.f32 %v3657_v8, %v792_v51  ;;  %v809_v41 = vadd.f32 %v3659_v19, %v793_v46  ;;  %v3689_v36 = vunpack.c.h.bf16 %v2490_v16  ;;  %v2163_v1 = vunpack.c.l.bf16 %v2519_v52  ;;  %v2520_v51 = vld [vmem:[#allocation17 + $0x20] sm:$0xff]  }
 0x108   :  { %v806_v53 = vadd.f32 %v3649_v9, %v790_v57  ;;  %v794_v33 = vmul.f32 %v2159_v43, %v3673_v26  ;;  %v3687_v57 = vunpack.c.h.bf16 %v2483_v47  ;;  %v2164_v63 = vunpack.c.h.bf16 %v2519_v52  ;;  %v2484_v9 = vld [vmem:[#allocation14 + $0x20] sm:$0xff]   ;;  %v2492_v43 = vld [vmem:[#allocation16 + $0x28] sm:$0xff]  }
 0x109   :  { %4371 = vst [vmem:[#allocation112_spill] sm:$0xff] %v3689_v36  ;;  %v823_v46 = vpack.c.bf16 %v809_v41, %v808_v42  ;;  %v3696_v59 = vunpack.c.l.bf16 %v2491_v21  ;;  %v3698_v16 = vunpack.c.h.bf16 %v2491_v21  ;;  %v2521_v52 = vld [vmem:[#allocation17 + $0x28] sm:$0xff]   ;;  %v3700_v8 = vunpack.c.l.bf16 %v2484_v9 }
 0x10a   :  { %v822_v44 = vpack.c.bf16 %v807_v10, %v806_v53  ;;  %4370 = vst [vmem:[#allocation111_spill] sm:$0xff] %v3687_v57  ;;  %v810_v19 = vadd.f32 %v3667_v15, %v794_v33  ;;  %v811_v53 = vadd.f32 %v3669_v34, %v795_v0  ;;  %v796_v10 = vmul.f32 %v2163_v1, %v3685_v62  ;;  %v2485_v1 = vld [vmem:[#allocation14 + $0x28] sm:$0xff]  }
 0x10b   :  { %v797_v47 = vmul.f32 %v2164_v63, %v3689_v36  ;;  %4372 = vst [vmem:[#allocation113_spill] sm:$0xff] %v3696_v59  ;;  %4373 = vst [vmem:[#allocation114_spill] sm:$0xff] %v3698_v16  ;;  %v2167_v41 = vunpack.c.l.bf16 %v2520_v51  ;;  %v2168_v42 = vunpack.c.h.bf16 %v2520_v51  ;;  %v3706_v15 = vunpack.c.l.bf16 %v2492_v43 }
 0x10c   :  { %2723 = vmatpush3.bf16.msra.mxu0 %v822_v44  ;;  %4374 = vst [vmem:[#allocation115_spill] sm:$0xff] %v3700_v8  ;;  %v3702_v44 = vunpack.c.h.bf16 %v2484_v9  ;;  %v824_v33 = vpack.c.bf16 %v811_v53, %v810_v19  ;;  %v812_v0 = vadd.f32 %v3681_v2, %v796_v10  ;;  %v3710_v36 = vunpack.c.h.bf16 %v2492_v43 }
 0x10d   :  { %2724 = vmatprep.subr.bf16.mxu0 %v4336_v31  ;;  %v813_v34 = vadd.f32 %v3687_v57, %v797_v47  ;;  %4376 = vst [vmem:[#allocation117_spill] sm:$0xff] %v3706_v15  ;;  %v798_v63 = vmul.f32 %v2167_v41, %v3696_v59  ;;  %v799_v21 = vmul.f32 %v2168_v42, %v3698_v16  ;;  %v2171_v62 = vunpack.c.l.bf16 %v2521_v52  ;;  %v2526_v16 = vld [vmem:[#allocation8 + $0x98] sm:$0xff]  }
 0x10e   :  { %4375 = vst [vmem:[#allocation116_spill] sm:$0xff] %v3702_v44  ;;  %4377 = vst [vmem:[#allocation118_spill] sm:$0xff] %v3710_v36  ;;  %v2172_v9 = vunpack.c.h.bf16 %v2521_v52  ;;  %v3713_v19 = vunpack.c.l.bf16 %v2485_v1  ;;  %v3715_v53 = vunpack.c.h.bf16 %v2485_v1 }
 0x10f   :  { %v825_v51 = vpack.c.bf16 %v813_v34, %v812_v0  ;;  %v814_v10 = vadd.f32 %v3700_v8, %v798_v63  ;;  %v800_v47 = vmul.f32 %v2171_v62, %v3706_v15  ;;  %v2182_v62 = vld [vmem:[#allocation8 + $0x80] sm:$0xff]  }
 0x110   :  { %2725 = vmatpush3.bf16.msra.mxu0 %v823_v46  ;;  %4378 = vst [vmem:[#allocation119_spill] sm:$0xff] %v3713_v19  ;;  %4379 = vst [vmem:[#allocation120_spill] sm:$0xff] %v3715_v53  ;;  %v815_v46 = vadd.f32 %v3702_v44, %v799_v21  ;;  %v801_v41 = vmul.f32 %v2172_v9, %v3710_v36  ;;  %v2183_v0 = vunpack.c.l.bf16 %v2182_v62  ;;  %v2184_v63 = vunpack.c.h.bf16 %v2182_v62  ;;  %v2524_v9 = vld [vmem:[#allocation8 + $0x88] sm:$0xff]   ;;  %v1780_v62 = vld [vmem:[%s4091_s4] ss:$0 sm:$0xff] }
 0x111   :  { %2726 = vmatprep.subr.bf16.mxu0 %v4336_v31  ;;  %v816_v52 = vadd.f32 %v3713_v19, %v800_v47  ;;  %v2187_v47 = vunpack.c.l.bf16 %v2524_v9 }
 0x112   :  { %v826_v43 = vpack.c.bf16 %v815_v46, %v814_v10  ;;  %v817_v34 = vadd.f32 %v3715_v53, %v801_v41  ;;  %v943_v10 = vmul.f32 %v2183_v0, %v3351_v17  ;;  %v944_v46 = vmul.f32 %v2184_v63, %v3353_v18  ;;  %v2534_v63 = vld [vmem:[#allocation8 + $0xd8] sm:$0xff]  }
 0x113   :  { %v2188_v41 = vunpack.c.h.bf16 %v2524_v9  ;;  %v2227_v32 = vunpack.c.l.bf16 %v2534_v63 }
 0x114   :  { %2727 = vmatpush3.bf16.msra.mxu0 %v824_v33  ;;  %v827_v42 = vpack.c.bf16 %v817_v34, %v816_v52  ;;  %v2532_v33 = vld [vmem:[#allocation8 + $0xc8] sm:$0xff]   ;;  %v975_v36 = vadd.f32 %v3347_v13, %v943_v10  ;;  %v976_v8 = vadd.f32 %v3349_v14, %v944_v46 }
 0x115   :  { %2728 = vmatprep.subr.bf16.mxu0 %v4336_v31  ;;  %v2219_v21 = vunpack.c.l.bf16 %v2532_v33  ;;  %v2220_v1 = vunpack.c.h.bf16 %v2532_v33 }
 0x117   :  { %v961_v52 = vmul.f32 %v2219_v21, %v3363_v29  ;;  %v962_v34 = vmul.f32 %v2220_v1, %v3365_v30  ;;  %v945_v21 = vmul.f32 %v2187_v47, %v3377_v45  ;;  %v946_v1 = vmul.f32 %v2188_v41, %v3379_v48 }
 0x118   :  { %2729 = vmatpush3.bf16.msra.mxu0 %v825_v51  ;;  %v2533_v51 = vld [vmem:[#allocation8 + $0xd0] sm:$0xff]   ;;  %v2196_v41 = vunpack.c.h.bf16 %v2526_v16 }
 0x119   :  { %2730 = vmatprep.subr.bf16.mxu0 %v4336_v31  ;;  %v2224_v19 = vunpack.c.h.bf16 %v2533_v51  ;;  %v993_v59 = vadd.f32 %v3357_v24, %v961_v52  ;;  %v994_v57 = vadd.f32 %v3359_v25, %v962_v34  ;;  %v977_v52 = vadd.f32 %v3371_v39, %v945_v21 }
 0x11a   :  { %v978_v34 = vadd.f32 %v3373_v40, %v946_v1 }
 0x11c   :  { %2731 = vmatpush3.bf16.msra.mxu0 %v826_v43  ;;  %v2525_v43 = vld [vmem:[#allocation8 + $0x90] sm:$0xff]  }
 0x11d   :  { %2732 = vmatprep.subr.bf16.mxu0 %v4336_v31  ;;  %v2191_v0 = vunpack.c.l.bf16 %v2525_v43  ;;  %v2192_v15 = vunpack.c.h.bf16 %v2525_v43  ;;  %v964_v43 = vmul.f32 %v2224_v19, %v3391_v61 }
 0x11f   :  { %v947_v46 = vmul.f32 %v2191_v0, %v3399_v12  ;;  %v948_v47 = vmul.f32 %v2192_v15, %v3403_v20  ;;  %v996_v61 = vadd.f32 %v3385_v56, %v964_v43  ;;  %v965_v0 = vmul.f32 %v2227_v32, %v3412_v35 }
 0x120   :  { %2733 = vmatpush3.bf16.msra.mxu0 %v827_v42  ;;  %v2223_v42 = vunpack.c.l.bf16 %v2533_v51 }
 0x121   :  { %2734 = vmatprep.subr.bf16.mxu0 %v4336_v31  ;;  %v1016_v31 = vpack.c.bf16 %v994_v57, %v993_v59  ;;  %v950_v57 = vmul.f32 %v2196_v41, %v3427_v58 }
 0x122   :  { %v963_v2 = vmul.f32 %v2223_v42, %v3389_v60 }
 0x1ba   :  { %v2598_v53 = vpop.f32.mrb[0].mxu0 }
 0x1bb   :  { %v2599_v33 = vpop.f32.mrb[1].mxu0 }
 0x1bc   :  { %v2600_v44 = vadd.f32 %v2599_v33, %v2598_v53  ;;  %v2601_v9 = vpop.f32.mrb[2].mxu0  ;;  %v2228_v53 = vunpack.c.h.bf16 %v2534_v63  ;;  %v2535_v33 = vld [vmem:[#allocation8 + $0xe0] sm:$0xff]  }
 0x1bd   :  { %v2602_v51 = vpop.f32.mrb[3].mxu0  ;;  %v2195_v9 = vunpack.c.l.bf16 %v2526_v16  ;;  %v2231_v42 = vunpack.c.l.bf16 %v2535_v33  ;;  %v2232_v19 = vunpack.c.h.bf16 %v2535_v33  ;;  %v2536_v16 = vld [vmem:[#allocation8 + $0xe8] sm:$0xff]  }
 0x1be   :  { %v630_v10 = vadd.f32 %v2600_v44, %v1780_v62  ;;  %v1007_v51 = vpack.c.bf16 %v976_v8, %v975_v36  ;;  %v995_v44 = vadd.f32 %v3383_v55, %v963_v2  ;;  %v2527_v62 = vld [vmem:[#allocation8 + $0xa0] sm:$0xff]   ;;  %v966_v15 = vmul.f32 %v2228_v53, %v3415_v38  ;;  %v2528_v53 = vld [vmem:[#allocation8 + $0xa8] sm:$0xff]  }
 0x1bf   :  { %v979_v8 = vadd.f32 %v3393_v3, %v947_v46  ;;  %v980_v36 = vadd.f32 %v3397_v11, %v948_v47  ;;  %v949_v21 = vmul.f32 %v2195_v9, %v3425_v54  ;;  %v1008_v2 = vpack.c.bf16 %v978_v34, %v977_v52  ;;  %v2537_v52 = vld [vmem:[#allocation8 + $0xf0] sm:$0xff]   ;;  %v4380_v34 = vld [vmem:[#allocation37_spill] sm:$0xff] }
 0x1c0   :  { %v635_v26 = vmax.f32 %v630_v10, 0.0  ;;  %v2199_v59 = vunpack.c.l.bf16 %v2527_v62  ;;  %v2200_v1 = vunpack.c.h.bf16 %v2527_v62  ;;  %v968_v32 = vmul.f32 %v2232_v19, %v3439_v23  ;;  %v4381_v19 = vld [vmem:[#allocation38_spill] sm:$0xff]  ;;  %v2529_v23 = vld [vmem:[#allocation8 + $0xb0] sm:$0xff]  }
 0x1c1   :  { %v2235_v10 = vunpack.c.l.bf16 %v2536_v16  ;;  %v2236_v43 = vunpack.c.h.bf16 %v2536_v16  ;;  %v1017_v33 = vpack.c.bf16 %v996_v61, %v995_v44  ;;  %v997_v46 = vadd.f32 %v3405_v27, %v965_v0  ;;  %v4383_v44 = vld [vmem:[#allocation33_spill] sm:$0xff] }
 0x1c2   :  { %v636_v63 = vpack.c.bf16 %v635_v26, %v635_v26  ;;  %v967_v26 = vmul.f32 %v2231_v42, %v3437_v22  ;;  %v998_v47 = vadd.f32 %v3407_v28, %v966_v15  ;;  %v1009_v9 = vpack.c.bf16 %v980_v36, %v979_v8  ;;  %v4384_v27 = vld [vmem:[#allocation41_spill] sm:$0xff]  ;;  %v4385_v8 = vld [vmem:[#allocation42_spill] sm:$0xff] }
 0x1c3   :  { %v981_v41 = vadd.f32 %v3418_v49, %v949_v21  ;;  %v951_v42 = vmul.f32 %v2199_v59, %v4380_v34  ;;  %v952_v62 = vmul.f32 %v2200_v1, %v4381_v19  ;;  %v2204_v16 = vunpack.c.h.bf16 %v2528_v53  ;;  %v2538_v34 = vld [vmem:[#allocation8 + $0xf8] sm:$0xff]   ;;  %v4386_v19 = vld [vmem:[#allocation35_spill] sm:$0xff] }
 0x1c4   :  { %2719 = vmatmul.mubr.bf16.vlgmr.msra.gmra.mrb[0].mxu1 %v636_v63  ;;  %v2203_v63 = vunpack.c.l.bf16 %v2528_v53  ;;  %v1000_v0 = vadd.f32 %v4383_v44, %v968_v32  ;;  %v969_v15 = vmul.f32 %v2235_v10, %v4384_v27  ;;  %v970_v36 = vmul.f32 %v2236_v43, %v4385_v8  ;;  %v4387_v28 = vld [vmem:[#allocation45_spill] sm:$0xff]  ;;  %v4389_v10 = vld [vmem:[#allocation36_spill] sm:$0xff]  ;;  %v4390_v43 = vld [vmem:[#allocation39_spill] sm:$0xff] }
 0x1c5   :  { %2623 = vmatpush3.bf16.msra.mxu1 %v1007_v51  ;;  %1063 = vmatprep.mubr.bf16.mxu1 %v3525_v37  ;;  %v982_v51 = vadd.f32 %v3420_v50, %v950_v57  ;;  %v1018_v21 = vpack.c.bf16 %v998_v47, %v997_v46  ;;  %v2239_v57 = vunpack.c.l.bf16 %v2537_v52  ;;  %v2240_v50 = vunpack.c.h.bf16 %v2537_v52  ;;  %v4388_v37 = vld [vmem:[#allocation46_spill] sm:$0xff]  ;;  %v4391_v46 = vld [vmem:[#allocation40_spill] sm:$0xff]  ;;  %v4392_v52 = vld [vmem:[#allocation49_spill] sm:$0xff] }
 0x1c6   :  { %2624 = vmatprep.subr.bf16.mxu1 %v1016_v31  ;;  %v4382_v31 = vld [vmem:[#allocation32_spill] sm:$0xff]  ;;  %v2207_v49 = vunpack.c.l.bf16 %v2529_v23  ;;  %v2208_v59 = vunpack.c.h.bf16 %v2529_v23  ;;  %v983_v53 = vadd.f32 %v4386_v19, %v951_v42  ;;  %v984_v44 = vadd.f32 %v4389_v10, %v952_v62  ;;  %v4393_v8 = vld [vmem:[#allocation50_spill] sm:$0xff]  ;;  %v4402_v27 = vld [vmem:[#allocation51_spill] sm:$0xff] }
 0x1c7   :  { %v999_v61 = vadd.f32 %v4382_v31, %v967_v26  ;;  %v1010_v1 = vpack.c.bf16 %v982_v51, %v981_v41  ;;  %v954_v26 = vmul.f32 %v2204_v16, %v4388_v37  ;;  %v2530_v31 = vld [vmem:[#allocation8 + $0xb8] sm:$0xff]   ;;  %v1002_v47 = vadd.f32 %v4391_v46, %v970_v36  ;;  %v2560_v19 = vld [vmem:[#allocation8 + $0x140] sm:$0xff]   ;;  %v4397_v10 = vld [vmem:[#allocation44_spill] sm:$0xff] }
 0x1c8   :  { %v971_v23 = vmul.f32 %v2239_v57, %v4392_v52  ;;  %v972_v41 = vmul.f32 %v2240_v50, %v4393_v8  ;;  %v2243_v51 = vunpack.c.l.bf16 %v2538_v34  ;;  %v2244_v42 = vunpack.c.h.bf16 %v2538_v34  ;;  %v4395_v16 = vld [vmem:[#allocation54_spill] sm:$0xff]  ;;  %v4398_v50 = vld [vmem:[#allocation47_spill] sm:$0xff]  ;;  %v4399_v8 = vld [vmem:[#allocation48_spill] sm:$0xff] }
 0x1c9   :  { %2625 = vmatpush3.bf16.msra.mxu1 %v1008_v2  ;;  %v953_v2 = vmul.f32 %v2203_v63, %v4387_v28  ;;  %v1019_v32 = vpack.c.bf16 %v1000_v0, %v999_v61  ;;  %v4394_v63 = vld [vmem:[#allocation53_spill] sm:$0xff]  ;;  %v956_v37 = vmul.f32 %v2208_v59, %v4395_v16  ;;  %v2212_v61 = vunpack.c.h.bf16 %v2530_v31  ;;  %v4396_v0 = vld [vmem:[#allocation43_spill] sm:$0xff]  ;;  %v2310_v52 = vld [vmem:[#allocation8 + $0x100] sm:$0xff]  }
 0x1ca   :  { %2626 = vmatprep.subr.bf16.mxu1 %v1017_v33  ;;  %v1001_v33 = vadd.f32 %v4390_v43, %v969_v15  ;;  %v955_v28 = vmul.f32 %v2207_v49, %v4394_v63  ;;  %v986_v15 = vadd.f32 %v4397_v10, %v954_v26  ;;  %v1011_v36 = vpack.c.bf16 %v984_v44, %v983_v53  ;;  %v4400_v49 = vld [vmem:[#allocation57_spill] sm:$0xff]  ;;  %v4401_v59 = vld [vmem:[#allocation58_spill] sm:$0xff] }
 0x1cb   :  { %v985_v62 = vadd.f32 %v4396_v0, %v953_v2  ;;  %v2343_v46 = vunpack.c.l.bf16 %v2560_v19  ;;  %v2344_v57 = vunpack.c.h.bf16 %v2560_v19  ;;  %v1003_v34 = vadd.f32 %v4398_v50, %v971_v23  ;;  %v4403_v0 = vld [vmem:[#allocation52_spill] sm:$0xff]  ;;  %v4405_v53 = vld [vmem:[#allocation62_spill] sm:$0xff] }
 0x1cc   :  { %v1004_v43 = vadd.f32 %v4399_v8, %v972_v41  ;;  %v973_v63 = vmul.f32 %v2243_v51, %v4400_v49  ;;  %v974_v16 = vmul.f32 %v2244_v42, %v4401_v59  ;;  %v987_v2 = vadd.f32 %v4402_v27, %v955_v28  ;;  %v2553_v42 = vld [vmem:[#allocation8 + $0x108] sm:$0xff]  }
 0x1cd   :  { %2627 = vmatpush3.bf16.msra.mxu1 %v1009_v9  ;;  %v2211_v9 = vunpack.c.l.bf16 %v2530_v31  ;;  %v2561_v31 = vld [vmem:[#allocation8 + $0x148] sm:$0xff]   ;;  %v988_v26 = vadd.f32 %v4403_v0, %v956_v37  ;;  %v1012_v19 = vpack.c.bf16 %v986_v15, %v985_v62  ;;  %v1399_v23 = vmul.f32 %v2343_v46, %v3343_v6  ;;  %v4407_v37 = vld [vmem:[#allocation56_spill] sm:$0xff] }
 0x1ce   :  { %2628 = vmatprep.subr.bf16.mxu1 %v1018_v21  ;;  %v1020_v21 = vpack.c.bf16 %v1002_v47, %v1001_v33  ;;  %v958_v33 = vmul.f32 %v2212_v61, %v4405_v53  ;;  %v2311_v47 = vunpack.c.l.bf16 %v2310_v52  ;;  %v1400_v41 = vmul.f32 %v2344_v57, %v3345_v7  ;;  %v4406_v28 = vld [vmem:[#allocation55_spill] sm:$0xff]  ;;  %v4409_v62 = vld [vmem:[#allocation60_spill] sm:$0xff] }
 0x1cf   :  { %v2347_v51 = vunpack.c.l.bf16 %v2561_v31  ;;  %v2348_v49 = vunpack.c.h.bf16 %v2561_v31  ;;  %v1021_v59 = vpack.c.bf16 %v1004_v43, %v1003_v34  ;;  %v1005_v27 = vadd.f32 %v4406_v28, %v973_v63  ;;  %v2554_v57 = vld [vmem:[#allocation8 + $0x110] sm:$0xff]  }
 0x1d0   :  { %v1006_v0 = vadd.f32 %v4407_v37, %v974_v16  ;;  %v990_v15 = vadd.f32 %v4409_v62, %v958_v33  ;;  %v2315_v7 = vunpack.c.l.bf16 %v2553_v42  ;;  %v2316_v46 = vunpack.c.h.bf16 %v2553_v42 }
 0x1d1   :  { %2629 = vmatpush3.bf16.msra.mxu1 %v1010_v1  ;;  %v4404_v1 = vld [vmem:[#allocation61_spill] sm:$0xff]  ;;  %v1431_v43 = vadd.f32 %v3339_v4, %v1399_v23  ;;  %v1432_v63 = vadd.f32 %v3341_v5, %v1400_v41  ;;  %v1401_v16 = vmul.f32 %v2347_v51, %v3363_v29 }
 0x1d2   :  { %2630 = vmatprep.subr.bf16.mxu1 %v1019_v32  ;;  %v957_v44 = vmul.f32 %v2211_v9, %v4404_v1  ;;  %v2312_v32 = vunpack.c.h.bf16 %v2310_v52  ;;  %v1013_v9 = vpack.c.bf16 %v988_v26, %v987_v2  ;;  %v4408_v1 = vld [vmem:[#allocation59_spill] sm:$0xff]  ;;  %v2562_v52 = vld [vmem:[#allocation8 + $0x150] sm:$0xff]   ;;  %v1022_v34 = vpack.c.bf16 %v1006_v0, %v1005_v27  ;;  %v2555_v0 = vld [vmem:[#allocation8 + $0x118] sm:$0xff]  }
 0x1d3   :  { %v2351_v31 = vunpack.c.l.bf16 %v2562_v52  ;;  %v2352_v2 = vunpack.c.h.bf16 %v2562_v52  ;;  %v2319_v26 = vunpack.c.l.bf16 %v2554_v57  ;;  %v1386_v4 = vmul.f32 %v2316_v46, %v3379_v48  ;;  %v4411_v46 = vld [vmem:[#allocation72_spill] sm:$0xff] }
 0x1d4   :  { %v989_v61 = vadd.f32 %v4408_v1, %v957_v44  ;;  %v1384_v6 = vmul.f32 %v2312_v32, %v3353_v18  ;;  %v2563_v44 = vld [vmem:[#allocation8 + $0x158] sm:$0xff]   ;;  %v1455_v29 = vpack.c.bf16 %v1432_v63, %v1431_v43  ;;  %v2323_v51 = vunpack.c.l.bf16 %v2555_v0 }
 0x1d5   :  { %2631 = vmatpush3.bf16.msra.mxu1 %v1011_v36  ;;  %v1383_v36 = vmul.f32 %v2311_v47, %v3351_v17  ;;  %v2320_v17 = vunpack.c.h.bf16 %v2554_v57  ;;  %v2356_v32 = vunpack.c.h.bf16 %v2563_v44 }
 0x1d6   :  { %2632 = vmatprep.subr.bf16.mxu1 %v1020_v21  ;;  %v1402_v21 = vmul.f32 %v2348_v49, %v3365_v30  ;;  %v1416_v33 = vadd.f32 %v3349_v14, %v1384_v6  ;;  %v1014_v5 = vpack.c.bf16 %v990_v15, %v989_v61  ;;  %v1433_v30 = vadd.f32 %v3357_v24, %v1401_v16  ;;  %v2564_v14 = vld [vmem:[#allocation8 + $0x160] sm:$0xff]   ;;  %v2565_v15 = vld [vmem:[#allocation8 + $0x168] sm:$0xff]  }
 0x1d7   :  { %v1415_v18 = vadd.f32 %v3347_v13, %v1383_v36  ;;  %v1403_v49 = vmul.f32 %v2351_v31, %v3389_v60  ;;  %v2355_v13 = vunpack.c.l.bf16 %v2563_v44  ;;  %v1388_v48 = vmul.f32 %v2320_v17, %v3403_v20 }
 0x1d8   :  { %v1434_v27 = vadd.f32 %v3359_v25, %v1402_v21  ;;  %v1418_v24 = vadd.f32 %v3373_v40, %v1386_v4  ;;  %v2556_v25 = vld [vmem:[#allocation8 + $0x120] sm:$0xff]   ;;  %v2359_v60 = vunpack.c.l.bf16 %v2564_v14  ;;  %v2360_v61 = vunpack.c.h.bf16 %v2564_v14  ;;  %v2557_v21 = vld [vmem:[#allocation8 + $0x128] sm:$0xff]  }
 0x1d9   :  { %2633 = vmatpush3.bf16.msra.mxu1 %v1012_v19  ;;  %v1385_v19 = vmul.f32 %v2315_v7, %v3377_v45  ;;  %v1387_v45 = vmul.f32 %v2319_v26, %v3399_v12  ;;  %v1447_v23 = vpack.c.bf16 %v1416_v33, %v1415_v18  ;;  %v1435_v52 = vadd.f32 %v3383_v55, %v1403_v49  ;;  %v4417_v18 = vld [vmem:[#allocation38_spill] sm:$0xff]  ;;  %v4421_v49 = vld [vmem:[#allocation31_spill] sm:$0xff] }
 0x1da   :  { %2634 = vmatprep.subr.bf16.mxu1 %v1021_v59  ;;  %v4410_v59 = vld [vmem:[#allocation27_spill] sm:$0xff]  ;;  %v1456_v42 = vpack.c.bf16 %v1434_v27, %v1433_v30  ;;  %v1405_v20 = vmul.f32 %v2355_v13, %v3412_v35  ;;  %v1406_v36 = vmul.f32 %v2356_v32, %v3415_v38  ;;  %v1420_v40 = vadd.f32 %v3397_v11, %v1388_v48  ;;  %v4412_v35 = vld [vmem:[#allocation34_spill] sm:$0xff]  ;;  %v4423_v32 = vld [vmem:[#allocation33_spill] sm:$0xff] }
 0x1db   :  { %v1404_v47 = vmul.f32 %v2352_v2, %v4410_v59  ;;  %v1417_v41 = vadd.f32 %v3371_v39, %v1385_v19  ;;  %v1419_v39 = vadd.f32 %v3393_v3, %v1387_v45  ;;  %v2327_v6 = vunpack.c.l.bf16 %v2556_v25  ;;  %v4413_v3 = vld [vmem:[#allocation63_spill] sm:$0xff]  ;;  %v4415_v2 = vld [vmem:[#allocation29_spill] sm:$0xff]  ;;  %v2566_v19 = vld [vmem:[#allocation8 + $0x170] sm:$0xff]  }
 0x1dc   :  { %v2328_v7 = vunpack.c.h.bf16 %v2556_v25  ;;  %v1389_v43 = vmul.f32 %v2323_v51, %v3425_v54  ;;  %v2363_v63 = vunpack.c.l.bf16 %v2565_v15  ;;  %v2364_v16 = vunpack.c.h.bf16 %v2565_v15  ;;  %v4416_v54 = vld [vmem:[#allocation37_spill] sm:$0xff]  ;;  %v4420_v27 = vld [vmem:[#allocation30_spill] sm:$0xff]  ;;  %v4425_v25 = vld [vmem:[#allocation36_spill] sm:$0xff] }
 0x1dd   :  { %2635 = vmatpush3.bf16.msra.mxu1 %v1013_v9  ;;  %v2324_v9 = vunpack.c.h.bf16 %v2555_v0  ;;  %v1436_v12 = vadd.f32 %v3385_v56, %v1404_v47  ;;  %v1448_v57 = vpack.c.bf16 %v1418_v24, %v1417_v41  ;;  %v1407_v56 = vmul.f32 %v2359_v60, %v3437_v22  ;;  %v4419_v22 = vld [vmem:[#allocation42_spill] sm:$0xff]  ;;  %v4422_v47 = vld [vmem:[#allocation32_spill] sm:$0xff]  ;;  %v4424_v24 = vld [vmem:[#allocation35_spill] sm:$0xff] }
 0x1de   :  { %2636 = vmatprep.subr.bf16.mxu1 %v1022_v34  ;;  %v1408_v38 = vmul.f32 %v2360_v61, %v4412_v35  ;;  %v4414_v34 = vld [vmem:[#allocation28_spill] sm:$0xff]  ;;  %v1438_v26 = vadd.f32 %v4415_v2, %v1406_v36  ;;  %v1449_v17 = vpack.c.bf16 %v1420_v40, %v1419_v39  ;;  %v1391_v44 = vmul.f32 %v2327_v6, %v4416_v54  ;;  %v4426_v60 = vld [vmem:[#allocation39_spill] sm:$0xff]  ;;  %v4429_v36 = vld [vmem:[#allocation46_spill] sm:$0xff] }
 0x1df   :  { %v1390_v55 = vmul.f32 %v2324_v9, %v3427_v58  ;;  %v1457_v11 = vpack.c.bf16 %v1436_v12, %v1435_v52  ;;  %v1437_v31 = vadd.f32 %v4414_v34, %v1405_v20  ;;  %v1392_v33 = vmul.f32 %v2328_v7, %v4417_v18  ;;  %v4418_v58 = vld [vmem:[#allocation41_spill] sm:$0xff]  ;;  %v2558_v41 = vld [vmem:[#allocation8 + $0x130] sm:$0xff]  }
 0x1e0   :  { %v1409_v4 = vmul.f32 %v2363_v63, %v4418_v58  ;;  %v2332_v30 = vunpack.c.h.bf16 %v2557_v21  ;;  %v1421_v0 = vadd.f32 %v4420_v27, %v1389_v43  ;;  %v1439_v13 = vadd.f32 %v4422_v47, %v1407_v56  ;;  %v2567_v9 = vld [vmem:[#allocation8 + $0x178] sm:$0xff]   ;;  %v4427_v15 = vld [vmem:[#allocation40_spill] sm:$0xff] }
 0x1e1   :  { %2637 = vmatpush3.bf16.msra.mxu1 %v1014_v5  ;;  %v1410_v5 = vmul.f32 %v2364_v16, %v4419_v22  ;;  %v1422_v59 = vadd.f32 %v4421_v49, %v1390_v55  ;;  %v1440_v14 = vadd.f32 %v4423_v32, %v1408_v38  ;;  %v1458_v45 = vpack.c.bf16 %v1438_v26, %v1437_v31  ;;  %v4428_v12 = vld [vmem:[#allocation45_spill] sm:$0xff]  ;;  %v4431_v16 = vld [vmem:[#allocation50_spill] sm:$0xff]  ;;  %v4438_v27 = vld [vmem:[#allocation52_spill] sm:$0xff] }
 0x1e2   :  { %2662 = vmatprep.subr.bf16.mxu1 %v1455_v29  ;;  %v2331_v29 = vunpack.c.l.bf16 %v2557_v21  ;;  %v2367_v48 = vunpack.c.l.bf16 %v2566_v19  ;;  %v1423_v51 = vadd.f32 %v4424_v24, %v1391_v44  ;;  %v1441_v61 = vadd.f32 %v4426_v60, %v1409_v4  ;;  %v4430_v43 = vld [vmem:[#allocation49_spill] sm:$0xff]  ;;  %v4436_v22 = vld [vmem:[#allocation58_spill] sm:$0xff] }
 0x1e3   :  { %v1442_v52 = vadd.f32 %v4427_v15, %v1410_v5  ;;  %v1394_v39 = vmul.f32 %v2332_v30, %v4429_v36  ;;  %v1450_v40 = vpack.c.bf16 %v1422_v59, %v1421_v0  ;;  %v1459_v6 = vpack.c.bf16 %v1440_v14, %v1439_v13  ;;  %v2559_v38 = vld [vmem:[#allocation8 + $0x138] sm:$0xff]   ;;  %v4437_v30 = vld [vmem:[#allocation51_spill] sm:$0xff] }
 0x1e4   :  { %1064 = vmatmul.mubr.bf16.vlgmr.msra.gmra.mrb[4].mxu1 %v4411_v46  ;;  %v1393_v20 = vmul.f32 %v2331_v29, %v4428_v12  ;;  %v2335_v7 = vunpack.c.l.bf16 %v2558_v41  ;;  %v1411_v63 = vmul.f32 %v2367_v48, %v4430_v43  ;;  %v2371_v56 = vunpack.c.l.bf16 %v2567_v9  ;;  %v4433_v2 = vld [vmem:[#allocation53_spill] sm:$0xff] }
 0x1e5   :  { %2663 = vmatpush3.bf16.msra.mxu1 %v1447_v23  ;;  %1503 = vmatprep.mubr.bf16.mxu1 %v4413_v3  ;;  %v2368_v23 = vunpack.c.h.bf16 %v2566_v19  ;;  %v2372_v35 = vunpack.c.h.bf16 %v2567_v9  ;;  %v1460_v3 = vpack.c.bf16 %v1442_v52, %v1441_v61  ;;  %v1426_v31 = vadd.f32 %v4397_v10, %v1394_v39  ;;  %v4435_v58 = vld [vmem:[#allocation57_spill] sm:$0xff] }
 0x1e6   :  { %2664 = vmatprep.subr.bf16.mxu1 %v1456_v42  ;;  %v1424_v42 = vadd.f32 %v4425_v25, %v1392_v33  ;;  %v1395_v26 = vmul.f32 %v2335_v7, %v4433_v2  ;;  %v2339_v44 = vunpack.c.l.bf16 %v2559_v38  ;;  %v2340_v18 = vunpack.c.h.bf16 %v2559_v38  ;;  %v4439_v49 = vld [vmem:[#allocation61_spill] sm:$0xff]  ;;  %v2568_v2 = vld [vmem:[#allocation13 + $0x88] sm:$0xff]  }
 0x1e7   :  { %v1412_v55 = vmul.f32 %v2368_v23, %v4431_v16  ;;  %v1443_v33 = vadd.f32 %v4398_v50, %v1411_v63  ;;  %v1413_v4 = vmul.f32 %v2371_v56, %v4435_v58  ;;  %v1414_v5 = vmul.f32 %v2372_v35, %v4436_v22  ;;  %v2494_v60 = vld [vmem:[#allocation16 + $0x38] sm:$0xff]   ;;  %v2374_v35 = vld [vmem:[#allocation13 + $0x80] sm:$0xff]   ;;  %v4446_v22 = vld [vmem:[#allocation71_spill] sm:$0xff] }
 0x1e8   :  { %v1451_v21 = vpack.c.bf16 %v1424_v42, %v1423_v51  ;;  %v1427_v10 = vadd.f32 %v4437_v30, %v1395_v26  ;;  %v1397_v59 = vmul.f32 %v2339_v44, %v4439_v49  ;;  %v1398_v47 = vmul.f32 %v2340_v18, %v4405_v53  ;;  %v2493_v53 = vld [vmem:[#allocation16 + $0x30] sm:$0xff]   ;;  %v2523_v61 = vld [vmem:[#allocation17 + $0x38] sm:$0xff]   ;;  %v4445_v58 = vld [vmem:[#allocation70_spill] sm:$0xff] }
 0x1e9   :  { %2665 = vmatpush3.bf16.msra.mxu1 %v1448_v57  ;;  %v2336_v57 = vunpack.c.h.bf16 %v2558_v41  ;;  %v1444_v19 = vadd.f32 %v4399_v8, %v1412_v55  ;;  %v1445_v50 = vadd.f32 %v4406_v28, %v1413_v4  ;;  %v1446_v8 = vadd.f32 %v4407_v37, %v1414_v5  ;;  %v2522_v28 = vld [vmem:[#allocation17 + $0x30] sm:$0xff]   ;;  %v2487_v36 = vld [vmem:[#allocation14 + $0x38] sm:$0xff]  }
 0x1ea   :  { %2666 = vmatprep.subr.bf16.mxu1 %v1457_v11  ;;  %v4432_v11 = vld [vmem:[#allocation43_spill] sm:$0xff]  ;;  %v1429_v14 = vadd.f32 %v4408_v1, %v1397_v59  ;;  %v4440_v41 = vmov 0.0   ;;  %v3861_v37 = vunpack.c.l.bf16 %v2493_v53  ;;  %v3863_v1 = vunpack.c.h.bf16 %v2493_v53  ;;  %v2486_v51 = vld [vmem:[#allocation14 + $0x30] sm:$0xff]   ;;  %v2570_v30 = vld [vmem:[#allocation13 + $0x98] sm:$0xff]  }
 0x1eb   :  { %v1425_v34 = vadd.f32 %v4432_v11, %v1393_v20  ;;  %v1461_v13 = vpack.c.bf16 %v1444_v19, %v1443_v33  ;;  %v1462_v48 = vpack.c.bf16 %v1446_v8, %v1445_v50  ;;  %v2176_v24 = vunpack.c.h.bf16 %v2522_v28  ;;  %v4443_v26 = vld [vmem:[#allocation64_spill] sm:$0xff]  ;;  %v4448_v49 = vld [vmem:[#allocation69_spill] sm:$0xff]  ;;  %v2572_v50 = vld [vmem:[#allocation13 + $0xa8] sm:$0xff]  }
 0x1ec   :  { %v3865_v25 = vunpack.c.l.bf16 %v2486_v51  ;;  %v3867_v42 = vunpack.c.h.bf16 %v2486_v51  ;;  %v3873_v12 = vunpack.c.l.bf16 %v2494_v60  ;;  %v3875_v20 = vunpack.c.h.bf16 %v2494_v60  ;;  %v4453_v60 = vld [vmem:[#allocation81_spill] sm:$0xff] }
 0x1ed   :  { %2667 = vmatpush3.bf16.msra.mxu1 %v1449_v17  ;;  %v4434_v17 = vld [vmem:[#allocation54_spill] sm:$0xff]  ;;  %v1452_v29 = vpack.c.bf16 %v1426_v31, %v1425_v34  ;;  %v2179_v39 = vunpack.c.l.bf16 %v2523_v61  ;;  %v3877_v7 = vunpack.c.l.bf16 %v2487_v36  ;;  %v2375_v38 = vunpack.c.l.bf16 %v2374_v35  ;;  %v4442_v34 = vld [vmem:[#allocation67_spill] sm:$0xff] }
 0x1ee   :  { %2668 = vmatprep.subr.bf16.mxu1 %v1458_v45  ;;  %v1396_v54 = vmul.f32 %v2336_v57, %v4434_v17  ;;  %v1430_v45 = vadd.f32 %v4409_v62, %v1398_v47  ;;  %v2175_v62 = vunpack.c.l.bf16 %v2522_v28  ;;  %v3879_v57 = vunpack.c.h.bf16 %v2487_v36  ;;  %v4450_v28 = vld [vmem:[#allocation75_spill] sm:$0xff] }
 0x1ef   :  { %v804_v43 = vmul.f32 %v2179_v39, %v3873_v12  ;;  %v2379_v18 = vunpack.c.l.bf16 %v2568_v2  ;;  %v2380_v33 = vunpack.c.h.bf16 %v2568_v2  ;;  %v2387_v8 = vunpack.c.l.bf16 %v2570_v30  ;;  %v4455_v39 = vld [vmem:[#allocation76_spill] sm:$0xff]  ;;  %v4460_v2 = vld [vmem:[#allocation83_spill] sm:$0xff] }
 0x1f0   :  { %v1428_v0 = vadd.f32 %v4438_v27, %v1396_v54  ;;  %v1454_v23 = vpack.c.bf16 %v1430_v45, %v1429_v14  ;;  %v802_v9 = vmul.f32 %v2175_v62, %v3861_v37  ;;  %v4444_v54 = vld [vmem:[#allocation65_spill] sm:$0xff]  ;;  %v4447_v27 = vld [vmem:[#allocation68_spill] sm:$0xff] }
 0x1f1   :  { %2669 = vmatpush3.bf16.msra.mxu1 %v1450_v40  ;;  %v2180_v40 = vunpack.c.h.bf16 %v2523_v61  ;;  %v820_v16 = vadd.f32 %v3877_v7, %v804_v43  ;;  %v1548_v4 = vmul.f32 %v2379_v18, %v4445_v58  ;;  %v1549_v5 = vmul.f32 %v2380_v33, %v4446_v22  ;;  %v4462_v33 = vld [vmem:[#allocation86_spill] sm:$0xff] }
 0x1f2   :  { %2670 = vmatprep.subr.bf16.mxu1 %v1459_v6  ;;  %v1453_v32 = vpack.c.bf16 %v1428_v0, %v1427_v10  ;;  %v818_v15 = vadd.f32 %v3865_v25, %v802_v9  ;;  %v2571_v10 = vld [vmem:[#allocation13 + $0xa0] sm:$0xff]   ;;  %v4452_v9 = vld [vmem:[#allocation79_spill] sm:$0xff] }
 0x1f3   :  { %v805_v63 = vmul.f32 %v2180_v40, %v3875_v20  ;;  %v1564_v0 = vadd.f32 %v4447_v27, %v1548_v4  ;;  %v1565_v59 = vadd.f32 %v4448_v49, %v1549_v5  ;;  %v2391_v14 = vunpack.c.l.bf16 %v2571_v10  ;;  %v4463_v5 = vld [vmem:[#allocation87_spill] sm:$0xff] }
 0x1f4   :  { %v2392_v45 = vunpack.c.h.bf16 %v2571_v10 }
 0x1f5   :  { %2671 = vmatpush3.bf16.msra.mxu1 %v1451_v21  ;;  %v821_v55 = vadd.f32 %v3879_v57, %v805_v63  ;;  %v2376_v21 = vunpack.c.h.bf16 %v2374_v35  ;;  %v1554_v61 = vmul.f32 %v2391_v14, %v4453_v60  ;;  %v2396_v63 = vunpack.c.h.bf16 %v2572_v50 }
 0x1f6   :  { %2672 = vmatprep.subr.bf16.mxu1 %v1460_v3  ;;  %v4441_v3 = vld [vmem:[#allocation66_spill] sm:$0xff] }
 0x1f7   :  { %v829_v56 = vpack.c.bf16 %v821_v55, %v820_v16  ;;  %v1546_v11 = vmul.f32 %v2375_v38, %v4441_v3  ;;  %v1547_v31 = vmul.f32 %v2376_v21, %v4442_v34  ;;  %v4457_v16 = vld [vmem:[#allocation77_spill] sm:$0xff] }
 0x1f8   :  { %v4459_v21 = vld [vmem:[#allocation85_spill] sm:$0xff] }
 0x1f9   :  { %2673 = vmatpush3.bf16.msra.mxu1 %v1452_v29  ;;  %v1562_v17 = vadd.f32 %v4443_v26, %v1546_v11  ;;  %v1563_v44 = vadd.f32 %v4444_v54, %v1547_v31  ;;  %v2569_v29 = vld [vmem:[#allocation13 + $0x90] sm:$0xff]  }
 0x1fa   :  { %2674 = vmatprep.subr.bf16.mxu1 %v1461_v13  ;;  %v2383_v47 = vunpack.c.l.bf16 %v2569_v29  ;;  %v2384_v13 = vunpack.c.h.bf16 %v2569_v29 }
 0x1fb   :  { %v1578_v19 = vpack.c.bf16 %v1563_v44, %v1562_v17  ;;  %v1570_v17 = vadd.f32 %v4460_v2, %v1554_v61  ;;  %v4461_v44 = vld [vmem:[#allocation84_spill] sm:$0xff] }
 0x1fc   :  { %v1551_v62 = vmul.f32 %v2384_v13, %v4450_v28 }
 0x1fd   :  { %2675 = vmatpush3.bf16.msra.mxu1 %v1453_v32  ;;  %v2388_v32 = vunpack.c.h.bf16 %v2570_v30  ;;  %v4464_v30 = vld [vmem:[#allocation88_spill] sm:$0xff] }
 0x1fe   :  { %2676 = vmatprep.subr.bf16.mxu1 %v1462_v48  ;;  %v1579_v48 = vpack.c.bf16 %v1565_v59, %v1564_v0  ;;  %v1567_v40 = vadd.f32 %v4455_v39, %v1551_v62  ;;  %v2573_v0 = vld [vmem:[#allocation13 + $0xb0] sm:$0xff]  }
 0x1ff   :  { %v2400_v13 = vunpack.c.h.bf16 %v2573_v0  ;;  %v4468_v62 = vld [vmem:[#allocation92_spill] sm:$0xff] }
 0x201   :  { %2677 = vmatpush3.bf16.msra.mxu1 %v1454_v23  ;;  %v4449_v23 = vld [vmem:[#allocation74_spill] sm:$0xff] }
 0x202   :  { %2782 = vmatprep.subr.bf16.mxu1 %v4440_v41  ;;  %v1550_v53 = vmul.f32 %v2383_v47, %v4449_v23  ;;  %v2399_v47 = vunpack.c.l.bf16 %v2573_v0 }
 0x204   :  { %1504 = vmatmul.mubr.bf16.vlgmr.msra.gmra.mrb[8].mxu1 %v4411_v46  ;;  %v803_v46 = vmul.f32 %v2176_v24, %v3863_v1  ;;  %v4451_v24 = vld [vmem:[#allocation78_spill] sm:$0xff] }
 0x205   :  { %2798 = vmatprep.mubr.msk.bf16.mxu1 %vm3119_vm0, %v4440_v41  ;;  %2783 = vmatpush3.bf16.msra.mxu1 %v1578_v19  ;;  %v1552_v51 = vmul.f32 %v2387_v8, %v4451_v24  ;;  %v1557_v19 = vmul.f32 %v2396_v63, %v4462_v33 }
 0x206   :  { %v819_v52 = vadd.f32 %v3867_v42, %v803_v46  ;;  %2784 = vmatprep.subr.bf16.mxu1 %v4440_v41  ;;  %v1553_v46 = vmul.f32 %v2388_v32, %v4452_v9  ;;  %v4466_v32 = vld [vmem:[#allocation90_spill] sm:$0xff] }
 0x207   :  { %v1568_v55 = vadd.f32 %v4457_v16, %v1552_v51  ;;  %v1573_v10 = vadd.f32 %v4464_v30, %v1557_v19  ;;  %v1559_v14 = vmul.f32 %v2400_v13, %v4466_v32  ;;  %v1783_v13 = vld [vmem:[%s4095_s8] ss:$0 sm:$0xff] }
 0x208   :  { %v828_v6 = vpack.c.bf16 %v819_v52, %v818_v15  ;;  %v2395_v15 = vunpack.c.l.bf16 %v2572_v50  ;;  %v4454_v52 = vld [vmem:[#allocation73_spill] sm:$0xff] }
 0x209   :  { %2785 = vmatpush3.bf16.msra.mxu1 %v1579_v48  ;;  %v1566_v36 = vadd.f32 %v4454_v52, %v1550_v53  ;;  %v4465_v50 = vld [vmem:[#allocation89_spill] sm:$0xff]  ;;  %v4467_v48 = vld [vmem:[#allocation91_spill] sm:$0xff]  ;;  %v1575_v51 = vadd.f32 %v4468_v62, %v1559_v14 }
 0x20a   :  { %2735 = vmatpush3.bf16.msra.mxu0 %v828_v6  ;;  %v4456_v6 = vld [vmem:[#allocation82_spill] sm:$0xff]  ;;  %2786 = vmatprep.subr.bf16.mxu1 %v4440_v41  ;;  %v1556_v11 = vmul.f32 %v2395_v15, %v4459_v21  ;;  %v1558_v8 = vmul.f32 %v2399_v47, %v4465_v50  ;;  %v2540_v47 = vld [vmem:[#allocation13 + $0x50] sm:$0xff]  }
 0x20b   :  { %2736 = vmatprep.subr.bf16.mxu0 %v4440_v41  ;;  %v1555_v43 = vmul.f32 %v2392_v45, %v4456_v6  ;;  %v1580_v38 = vpack.c.bf16 %v1567_v40, %v1566_v36  ;;  %v2574_v45 = vld [vmem:[#allocation13 + $0xb8] sm:$0xff]  }
 0x20c   :  { %v1572_v29 = vadd.f32 %v4463_v5, %v1556_v11  ;;  %v1574_v53 = vadd.f32 %v4467_v48, %v1558_v8  ;;  %v2404_v61 = vunpack.c.h.bf16 %v2574_v45  ;;  %v4469_v36 = vld [vmem:[#allocation93_spill] sm:$0xff] }
 0x20d   :  { %2787 = vmatpush3.bf16.msra.mxu1 %v1580_v38  ;;  %v1571_v18 = vadd.f32 %v4461_v44, %v1555_v43  ;;  %v4470_v43 = vld [vmem:[#allocation94_spill] sm:$0xff]  ;;  %v4472_v38 = vld [vmem:[#allocation96_spill] sm:$0xff] }
 0x20e   :  { %2737 = vmatpush3.bf16.msra.mxu0 %v829_v56  ;;  %v4458_v56 = vld [vmem:[#allocation80_spill] sm:$0xff]  ;;  %2788 = vmatprep.subr.bf16.mxu1 %v4440_v41  ;;  %v1583_v59 = vpack.c.bf16 %v1573_v10, %v1572_v29  ;;  %v1584_v15 = vpack.c.bf16 %v1575_v51, %v1574_v53  ;;  %v1561_v63 = vmul.f32 %v2404_v61, %v4470_v43  ;;  %v2256_v61 = vunpack.c.h.bf16 %v2540_v47 }
 0x20f   :  { %2742 = vmatprep.subr.bf16.mxu0 %v4440_v41  ;;  %v1569_v35 = vadd.f32 %v4458_v56, %v1553_v46  ;;  %v1582_v4 = vpack.c.bf16 %v1571_v18, %v1570_v17  ;;  %v2403_v46 = vunpack.c.l.bf16 %v2574_v45  ;;  %v2246_v17 = vld [vmem:[#allocation13 + $0x40] sm:$0xff]   ;;  %v2255_v45 = vunpack.c.l.bf16 %v2540_v47 }
 0x210   :  { %v1577_v11 = vadd.f32 %v4472_v38, %v1561_v63  ;;  %v2247_v18 = vunpack.c.l.bf16 %v2246_v17  ;;  %v2248_v19 = vunpack.c.h.bf16 %v2246_v17  ;;  %v1111_v17 = vmul.f32 %v2256_v61, %v4450_v28 }
 0x211   :  { %v1581_v31 = vpack.c.bf16 %v1569_v35, %v1568_v55  ;;  %v1560_v40 = vmul.f32 %v2403_v46, %v4469_v36  ;;  %v4471_v55 = vld [vmem:[#allocation95_spill] sm:$0xff] }
 0x212   :  { %v1106_v0 = vmul.f32 %v2247_v18, %v4441_v3 }
 0x213   :  { %2789 = vmatpush3.bf16.msra.mxu1 %v1581_v31  ;;  %v1576_v35 = vadd.f32 %v4471_v55, %v1560_v40  ;;  %v2541_v40 = vld [vmem:[#allocation13 + $0x58] sm:$0xff]  }
 0x214   :  { %2790 = vmatprep.subr.bf16.mxu1 %v4440_v41  ;;  %v1122_v51 = vadd.f32 %v4443_v26, %v1106_v0  ;;  %v2259_v18 = vunpack.c.l.bf16 %v2541_v40  ;;  %v2260_v26 = vunpack.c.h.bf16 %v2541_v40 }
 0x215   :  { %v1585_v31 = vpack.c.bf16 %v1577_v11, %v1576_v35 }
 0x217   :  { %2791 = vmatpush3.bf16.msra.mxu1 %v1582_v4  ;;  %v2539_v4 = vld [vmem:[#allocation13 + $0x48] sm:$0xff]  }
 0x218   :  { %2792 = vmatprep.subr.bf16.mxu1 %v4440_v41  ;;  %v2251_v29 = vunpack.c.l.bf16 %v2539_v4  ;;  %v2252_v10 = vunpack.c.h.bf16 %v2539_v4 }
 0x21a   :  { %v1108_v8 = vmul.f32 %v2251_v29, %v4445_v58  ;;  %v1109_v14 = vmul.f32 %v2252_v10, %v4446_v22  ;;  %v1110_v58 = vmul.f32 %v2255_v45, %v4449_v23  ;;  %v1113_v23 = vmul.f32 %v2260_v26, %v4452_v9  ;;  %v2544_v9 = vld [vmem:[#allocation13 + $0x70] sm:$0xff]  }
 0x21b   :  { %2793 = vmatpush3.bf16.msra.mxu1 %v1583_v59  ;;  %v1107_v59 = vmul.f32 %v2248_v19, %v4442_v34  ;;  %v2542_v19 = vld [vmem:[#allocation13 + $0x60] sm:$0xff]  }
 0x21c   :  { %2794 = vmatprep.subr.bf16.mxu1 %v4440_v41  ;;  %v1124_v11 = vadd.f32 %v4447_v27, %v1108_v8  ;;  %v1126_v29 = vadd.f32 %v4454_v52, %v1110_v58  ;;  %v2263_v10 = vunpack.c.l.bf16 %v2542_v19  ;;  %v2264_v0 = vunpack.c.h.bf16 %v2542_v19  ;;  %v2546_v58 = vld [vmem:[#allocation17 + $0x48] sm:$0xff]  }
 0x21d   :  { %v1123_v46 = vadd.f32 %v4444_v54, %v1107_v59  ;;  %v1127_v27 = vadd.f32 %v4455_v39, %v1111_v17  ;;  %v2543_v59 = vld [vmem:[#allocation13 + $0x68] sm:$0xff]   ;;  %v2283_v17 = vunpack.c.l.bf16 %v2546_v58 }
 0x21e   :  { %v1114_v28 = vmul.f32 %v2263_v10, %v4453_v60  ;;  %v1115_v47 = vmul.f32 %v2264_v0, %v4456_v6  ;;  %v2267_v52 = vunpack.c.l.bf16 %v2543_v59  ;;  %v2548_v0 = vld [vmem:[#allocation17 + $0x58] sm:$0xff]  }
 0x21f   :  { %2795 = vmatpush3.bf16.msra.mxu1 %v1584_v15  ;;  %v1138_v22 = vpack.c.bf16 %v1123_v46, %v1122_v51  ;;  %v1140_v8 = vpack.c.bf16 %v1127_v27, %v1126_v29  ;;  %v2271_v51 = vunpack.c.l.bf16 %v2544_v9  ;;  %v2272_v46 = vunpack.c.h.bf16 %v2544_v9 }
 0x220   :  { %2796 = vmatprep.subr.bf16.mxu1 %v4440_v41  ;;  %v1131_v45 = vadd.f32 %v4461_v44, %v1115_v47  ;;  %v4477_v47 = vld [vmem:[#allocation103_spill] sm:$0xff] }
 0x221   :  { %v1119_v44 = vmul.f32 %v2272_v46, %v4466_v32  ;;  %v4481_v46 = vld [vmem:[#allocation101_spill] sm:$0xff] }
 0x223   :  { %2797 = vmatpush3.bf16.msra.mxu1 %v1585_v31  ;;  %v1125_v31 = vadd.f32 %v4448_v49, %v1109_v14  ;;  %v1112_v49 = vmul.f32 %v2259_v18, %v4451_v24  ;;  %v1129_v24 = vadd.f32 %v4458_v56, %v1113_v23  ;;  %v1130_v14 = vadd.f32 %v4460_v2, %v1114_v28  ;;  %v2547_v18 = vld [vmem:[#allocation17 + $0x50] sm:$0xff]  }
 0x224   :  { %v1118_v2 = vmul.f32 %v2271_v51, %v4465_v50  ;;  %v2287_v29 = vunpack.c.l.bf16 %v2547_v18  ;;  %v2288_v10 = vunpack.c.h.bf16 %v2547_v18  ;;  %v4490_v18 = vld [vmem:[#allocation114_spill] sm:$0xff] }
 0x225   :  { %v1139_v4 = vpack.c.bf16 %v1125_v31, %v1124_v11  ;;  %v1128_v39 = vadd.f32 %v4457_v16, %v1112_v49  ;;  %v2545_v16 = vld [vmem:[#allocation13 + $0x78] sm:$0xff]   ;;  %v1142_v61 = vpack.c.bf16 %v1131_v45, %v1130_v14  ;;  %v4479_v14 = vld [vmem:[#allocation107_spill] sm:$0xff] }
 0x226   :  { %v1134_v40 = vadd.f32 %v4467_v48, %v1118_v2  ;;  %v4473_v48 = vld [vmem:[#allocation99_spill] sm:$0xff]  ;;  %v4475_v49 = vld [vmem:[#allocation97_spill] sm:$0xff]  ;;  %v1233_v45 = vmul.f32 %v2287_v29, %v4479_v14  ;;  %v2549_v2 = vld [vmem:[#allocation17 + $0x60] sm:$0xff]  }
 0x227   :  { %v1141_v6 = vpack.c.bf16 %v1129_v24, %v1128_v39  ;;  %v2291_v24 = vunpack.c.l.bf16 %v2548_v0  ;;  %v4492_v29 = vld [vmem:[#allocation116_spill] sm:$0xff] }
 0x297   :  { %v750_v53 = vpop.f32.mrb[0].mxu1 }
 0x298   :  { %v751_v15 = vadd.f32 %v1783_v13, %v750_v53  ;;  %v2720_v3 = vpop.f32.mrb[1].mxu1  ;;  %v2268_v13 = vunpack.c.h.bf16 %v2543_v59  ;;  %v1116_v53 = vmul.f32 %v2267_v52, %v4459_v21  ;;  %v2275_v21 = vunpack.c.l.bf16 %v2545_v16  ;;  %v4476_v59 = vld [vmem:[#allocation98_spill] sm:$0xff] }
 0x299   :  { %v753_v34 = vpop.f32.mrb[2].mxu1  ;;  %v2276_v3 = vunpack.c.h.bf16 %v2545_v16  ;;  %v1231_v52 = vmul.f32 %v2283_v17, %v4477_v47  ;;  %v4489_v17 = vld [vmem:[#allocation113_spill] sm:$0xff] }
 0x29a   :  { %v756_v63 = vmax.f32 %v751_v15, 0.0  ;;  %v2721_v35 = vpop.f32.mrb[3].mxu1  ;;  %v1117_v60 = vmul.f32 %v2268_v13, %v4462_v33  ;;  %v1132_v56 = vadd.f32 %v4463_v5, %v1116_v53  ;;  %v1135_v34 = vadd.f32 %v4468_v62, %v1119_v44  ;;  %v4478_v13 = vld [vmem:[#allocation104_spill] sm:$0xff]  ;;  %v4483_v44 = vld [vmem:[#allocation105_spill] sm:$0xff] }
 0x29b   :  { %v1121_v5 = vmul.f32 %v2276_v3, %v4470_v43  ;;  %v2284_v43 = vunpack.c.h.bf16 %v2546_v58  ;;  %v4480_v53 = vld [vmem:[#allocation108_spill] sm:$0xff]  ;;  %v1247_v16 = vadd.f32 %v4481_v46, %v1231_v52  ;;  %v4484_v3 = vld [vmem:[#allocation106_spill] sm:$0xff] }
 0x29c   :  { %v757_v54 = vpack.c.bf16 %v756_v63, %v756_v63  ;;  %v1133_v15 = vadd.f32 %v4464_v30, %v1117_v60  ;;  %v1120_v63 = vmul.f32 %v2275_v21, %v4469_v36  ;;  %v2278_v30 = vld [vmem:[#allocation17 + $0x40] sm:$0xff]   ;;  %v1144_v32 = vpack.c.bf16 %v1135_v34, %v1134_v40 }
 0x29d   :  { %v2279_v50 = vunpack.c.l.bf16 %v2278_v30  ;;  %v2280_v35 = vunpack.c.h.bf16 %v2278_v30  ;;  %v1137_v31 = vadd.f32 %v4472_v38, %v1121_v5  ;;  %v1234_v60 = vmul.f32 %v2288_v10, %v4480_v53  ;;  %v4485_v40 = vld [vmem:[#allocation110_spill] sm:$0xff] }
 0x29e   :  { %2739 = vmatmul.mubr.bf16.vlgmr.msra.gmra.mrb[4].mxu0 %v757_v54  ;;  %v1143_v33 = vpack.c.bf16 %v1133_v15, %v1132_v56  ;;  %v1136_v11 = vadd.f32 %v4471_v55, %v1120_v63  ;;  %v1786_v54 = vld [vmem:[%s4091_s4 + $0x1] ss:$0 sm:$0xff]  ;;  %v1249_v21 = vadd.f32 %v4483_v44, %v1233_v45  ;;  %v1235_v34 = vmul.f32 %v2291_v24, %v4485_v40  ;;  %v4486_v63 = vld [vmem:[#allocation112_spill] sm:$0xff] }
 0x29f   :  { %2743 = vmatpush3.bf16.msra.mxu0 %v1138_v22  ;;  %2758 = vmatprep.mubr.msk.bf16.mxu0 %vm3119_vm0, %v4440_v41  ;;  %v1229_v62 = vmul.f32 %v2279_v50, %v4473_v48  ;;  %v4474_v22 = vld [vmem:[#allocation100_spill] sm:$0xff]  ;;  %v2295_v50 = vunpack.c.l.bf16 %v2549_v2 }
 0x2a0   :  { %2744 = vmatprep.subr.bf16.mxu0 %v4440_v41  ;;  %v1230_v36 = vmul.f32 %v2280_v35, %v4474_v22  ;;  %v1145_v19 = vpack.c.bf16 %v1137_v31, %v1136_v11  ;;  %v2296_v35 = vunpack.c.h.bf16 %v2549_v2  ;;  %v4487_v31 = vld [vmem:[#allocation109_spill] sm:$0xff]  ;;  %v4496_v24 = vld [vmem:[#allocation120_spill] sm:$0xff] }
 0x2a1   :  { %v1245_v23 = vadd.f32 %v4475_v49, %v1229_v62  ;;  %v1251_v58 = vadd.f32 %v4487_v31, %v1235_v34  ;;  %v4488_v62 = vld [vmem:[#allocation111_spill] sm:$0xff]  ;;  %v2551_v34 = vld [vmem:[#allocation17 + $0x70] sm:$0xff]  }
 0x2a2   :  { %v1246_v28 = vadd.f32 %v4476_v59, %v1230_v36 }
 0x2a3   :  { %2745 = vmatpush3.bf16.msra.mxu0 %v1139_v4 }
 0x2a4   :  { %2746 = vmatprep.subr.bf16.mxu0 %v4440_v41  ;;  %v1261_v51 = vpack.c.bf16 %v1246_v28, %v1245_v23  ;;  %v4494_v23 = vld [vmem:[#allocation118_spill] sm:$0xff] }
 0x2a7   :  { %2747 = vmatpush3.bf16.msra.mxu0 %v1140_v8  ;;  %v1232_v8 = vmul.f32 %v2284_v43, %v4478_v13  ;;  %v1237_v43 = vmul.f32 %v2295_v50, %v4489_v17 }
 0x2a8   :  { %2748 = vmatprep.subr.bf16.mxu0 %v4440_v41 }
 0x2ab   :  { %2749 = vmatpush3.bf16.msra.mxu0 %v1141_v6  ;;  %v2292_v6 = vunpack.c.h.bf16 %v2548_v0  ;;  %v4493_v0 = vld [vmem:[#allocation117_spill] sm:$0xff] }
 0x2ac   :  { %2750 = vmatprep.subr.bf16.mxu0 %v4440_v41 }
 0x2ad   :  { %v1236_v5 = vmul.f32 %v2292_v6, %v4486_v63  ;;  %v1792_v6 = vld [vmem:[%s4091_s4 + $0x2] ss:$0 sm:$0xff] }
 0x2af   :  { %2751 = vmatpush3.bf16.msra.mxu0 %v1142_v61  ;;  %v4482_v61 = vld [vmem:[#allocation102_spill] sm:$0xff]  ;;  %v1252_v36 = vadd.f32 %v4488_v62, %v1236_v5  ;;  %v2303_v5 = vunpack.c.l.bf16 %v2551_v34 }
 0x2b0   :  { %2752 = vmatprep.subr.bf16.mxu0 %v4440_v41  ;;  %v1248_v56 = vadd.f32 %v4482_v61, %v1232_v8  ;;  %v4495_v8 = vld [vmem:[#allocation119_spill] sm:$0xff] }
 0x2b1   :  { %v1241_v50 = vmul.f32 %v2303_v5, %v3861_v37 }
 0x2b2   :  { %v1262_v30 = vpack.c.bf16 %v1248_v56, %v1247_v16 }
 0x2b3   :  { %2753 = vmatpush3.bf16.msra.mxu0 %v1143_v33  ;;  %v1250_v33 = vadd.f32 %v4484_v3, %v1234_v60 }
 0x2b4   :  { %2754 = vmatprep.subr.bf16.mxu0 %v4440_v41 }
 0x2b5   :  { %v1263_v11 = vpack.c.bf16 %v1250_v33, %v1249_v21 }
 0x2b7   :  { %v2638_v26 = vpop.f32.mrb[4].mxu1  ;;  %2755 = vmatpush3.bf16.msra.mxu0 %v1144_v32  ;;  %v2550_v32 = vld [vmem:[#allocation17 + $0x68] sm:$0xff]  }
 0x2b8   :  { %v2639_v55 = vpop.f32.mrb[5].mxu1  ;;  %2756 = vmatprep.subr.bf16.mxu0 %v4440_v41 }
 0x2b9   :  { %v2640_v38 = vadd.f32 %v2639_v55, %v2638_v26  ;;  %v2641_v4 = vpop.f32.mrb[6].mxu1  ;;  %v1238_v26 = vmul.f32 %v2296_v35, %v4490_v18  ;;  %v1264_v55 = vpack.c.bf16 %v1252_v36, %v1251_v58 }
 0x2ba   :  { %v2642_v27 = vpop.f32.mrb[7].mxu1 }
 0x2bb   :  { %v1066_v39 = vadd.f32 %v2640_v38, %v1786_v54  ;;  %2757 = vmatpush3.bf16.msra.mxu0 %v1145_v19  ;;  %v2299_v19 = vunpack.c.l.bf16 %v2550_v32  ;;  %v2300_v54 = vunpack.c.h.bf16 %v2550_v32  ;;  %v4491_v38 = vld [vmem:[#allocation115_spill] sm:$0xff]  ;;  %v1254_v10 = vadd.f32 %v4492_v29, %v1238_v26  ;;  %v2552_v32 = vld [vmem:[#allocation17 + $0x78] sm:$0xff]  }
 0x2bc   :  { %2762 = vmatprep.subr.bf16.mxu0 %v4440_v41  ;;  %v1253_v4 = vadd.f32 %v4491_v38, %v1237_v43  ;;  %v2307_v36 = vunpack.c.l.bf16 %v2552_v32  ;;  %v2308_v43 = vunpack.c.h.bf16 %v2552_v32 }
 0x2bd   :  { %v1071_v9 = vmax.f32 %v1066_v39, 0.0  ;;  %v1239_v27 = vmul.f32 %v2299_v19, %v4493_v0  ;;  %v1240_v28 = vmul.f32 %v2300_v54, %v4494_v23 }
 0x2be   :  { %v1265_v52 = vpack.c.bf16 %v1254_v10, %v1253_v4  ;;  %v1243_v19 = vmul.f32 %v2307_v36, %v3873_v12  ;;  %v1244_v54 = vmul.f32 %v2308_v43, %v3875_v20 }
 0x2bf   :  { %v1072_v15 = vpack.c.bf16 %v1071_v9, %v1071_v9  ;;  %v1255_v39 = vadd.f32 %v4495_v8, %v1239_v27  ;;  %v1256_v9 = vadd.f32 %v4496_v24, %v1240_v28  ;;  %v2406_v27 = vld [vmem:[#allocation17 + $0x80] sm:$0xff]  }
 0x2c0   :  { %v1260_v4 = vadd.f32 %v3879_v57, %v1244_v54  ;;  %v2407_v28 = vunpack.c.l.bf16 %v2406_v27 }
 0x2c1   :  { %2759 = vmatmul.mubr.bf16.vlgmr.msra.gmra.mrb[8].mxu0 %v1072_v15  ;;  %v1266_v45 = vpack.c.bf16 %v1256_v9, %v1255_v39  ;;  %v2575_v39 = vld [vmem:[#allocation17 + $0x88] sm:$0xff]  }
 0x2c2   :  { %2763 = vmatpush3.bf16.msra.mxu0 %v1261_v51  ;;  %2778 = vmatprep.mubr.msk.bf16.mxu0 %vm3119_vm0, %v4440_v41  ;;  %v2411_v9 = vunpack.c.l.bf16 %v2575_v39 }
 0x2c3   :  { %2764 = vmatprep.subr.bf16.mxu0 %v4440_v41 }
 0x2c6   :  { %2765 = vmatpush3.bf16.msra.mxu0 %v1262_v30  ;;  %v2304_v30 = vunpack.c.h.bf16 %v2551_v34 }
 0x2c7   :  { %2766 = vmatprep.subr.bf16.mxu0 %v4440_v41 }
 0x2c8   :  { %v1242_v35 = vmul.f32 %v2304_v30, %v3863_v1 }
 0x2ca   :  { %2767 = vmatpush3.bf16.msra.mxu0 %v1263_v11  ;;  %v1257_v11 = vadd.f32 %v3865_v25, %v1241_v50  ;;  %v1258_v58 = vadd.f32 %v3867_v42, %v1242_v35  ;;  %v2577_v50 = vld [vmem:[#allocation17 + $0x98] sm:$0xff]  }
 0x2cb   :  { %2768 = vmatprep.subr.bf16.mxu0 %v4440_v41  ;;  %v2419_v43 = vunpack.c.l.bf16 %v2577_v50 }
 0x2cc   :  { %v1267_v26 = vpack.c.bf16 %v1258_v58, %v1257_v11 }
 0x2ce   :  { %2769 = vmatpush3.bf16.msra.mxu0 %v1264_v55  ;;  %v1259_v55 = vadd.f32 %v3877_v7, %v1243_v19 }
 0x2cf   :  { %2770 = vmatprep.subr.bf16.mxu0 %v4440_v41 }
 0x2d0   :  { %v1268_v10 = vpack.c.bf16 %v1260_v4, %v1259_v55 }
 0x2d2   :  { %2771 = vmatpush3.bf16.msra.mxu0 %v1265_v52  ;;  %v2408_v52 = vunpack.c.h.bf16 %v2406_v27 }
 0x2d3   :  { %2772 = vmatprep.subr.bf16.mxu0 %v4440_v41 }
 0x2d6   :  { %2773 = vmatpush3.bf16.msra.mxu0 %v1266_v45  ;;  %v2412_v45 = vunpack.c.h.bf16 %v2575_v39 }
 0x2d7   :  { %v2678_v60 = vpop.f32.mrb[8].mxu1  ;;  %2774 = vmatprep.subr.bf16.mxu0 %v4440_v41 }
 0x2d8   :  { %v2679_v51 = vpop.f32.mrb[9].mxu1 }
 0x2d9   :  { %v2680_v16 = vadd.f32 %v2679_v51, %v2678_v60  ;;  %v2681_v56 = vpop.f32.mrb[10].mxu1  ;;  %v1669_v60 = vmul.f32 %v2407_v28, %v4473_v48  ;;  %v2576_v51 = vld [vmem:[#allocation17 + $0x90] sm:$0xff]  }
 0x2da   :  { %v2682_v15 = vpop.f32.mrb[11].mxu1  ;;  %2775 = vmatpush3.bf16.msra.mxu0 %v1267_v26  ;;  %v1671_v56 = vmul.f32 %v2411_v9, %v4477_v47  ;;  %v2416_v5 = vunpack.c.h.bf16 %v2576_v51  ;;  %v2578_v26 = vld [vmem:[#allocation17 + $0xa0] sm:$0xff]  }
 0x2db   :  { %v1506_v2 = vadd.f32 %v2680_v16, %v1792_v6  ;;  %2776 = vmatprep.subr.bf16.mxu0 %v4440_v41  ;;  %v1670_v6 = vmul.f32 %v2408_v52, %v4474_v22  ;;  %v1788_v16 = vld [vmem:[%s4095_s8 + $0x1] ss:$0 sm:$0xff]  ;;  %v1672_v15 = vmul.f32 %v2412_v45, %v4478_v13  ;;  %v2423_v55 = vunpack.c.l.bf16 %v2578_v26 }
 0x2dc   :  { %v1687_v11 = vadd.f32 %v4481_v46, %v1671_v56  ;;  %v1674_v36 = vmul.f32 %v2416_v5, %v4480_v53  ;;  %v2424_v4 = vunpack.c.h.bf16 %v2578_v26 }
 0x2dd   :  { %v1511_v21 = vmax.f32 %v1506_v2, 0.0  ;;  %v2415_v2 = vunpack.c.l.bf16 %v2576_v51  ;;  %v1686_v34 = vadd.f32 %v4476_v59, %v1670_v6  ;;  %v1688_v58 = vadd.f32 %v4482_v61, %v1672_v15 }
 0x2de   :  { %2777 = vmatpush3.bf16.msra.mxu0 %v1268_v10  ;;  %v1690_v46 = vadd.f32 %v4484_v3, %v1674_v36  ;;  %v1675_v61 = vmul.f32 %v2419_v43, %v4485_v40  ;;  %v2579_v10 = vld [vmem:[#allocation17 + $0xa8] sm:$0xff]   ;;  %v1677_v53 = vmul.f32 %v2423_v55, %v4489_v17  ;;  %v1678_v27 = vmul.f32 %v2424_v4, %v4490_v18 }
 0x2df   :  { %v1512_v33 = vpack.c.bf16 %v1511_v21, %v1511_v21  ;;  %2802 = vmatprep.subr.bf16.mxu0 %v4440_v41  ;;  %v1673_v47 = vmul.f32 %v2415_v2, %v4479_v14  ;;  %v1702_v19 = vpack.c.bf16 %v1688_v58, %v1687_v11  ;;  %v2428_v28 = vunpack.c.h.bf16 %v2579_v10 }
 0x2e0   :  { %v1691_v3 = vadd.f32 %v4487_v31, %v1675_v61  ;;  %v1693_v39 = vadd.f32 %v4491_v38, %v1677_v53  ;;  %v1694_v9 = vadd.f32 %v4492_v29, %v1678_v27  ;;  %v2581_v31 = vld [vmem:[#allocation17 + $0xb8] sm:$0xff]  }
 0x2e1   :  { %2799 = vmatmul.mubr.bf16.vlgmr.msra.gmra.mrb[12].mxu1 %v1512_v33  ;;  %v1685_v33 = vadd.f32 %v4475_v49, %v1669_v60  ;;  %v2420_v49 = vunpack.c.h.bf16 %v2577_v50  ;;  %v1689_v54 = vadd.f32 %v4483_v44, %v1673_v47  ;;  %v2427_v44 = vunpack.c.l.bf16 %v2579_v10 }
 0x2e2   :  { %v1680_v17 = vmul.f32 %v2428_v28, %v4494_v23  ;;  %v1705_v51 = vpack.c.bf16 %v1694_v9, %v1693_v39  ;;  %v2436_v56 = vunpack.c.h.bf16 %v2581_v31 }
 0x2e3   :  { %v1701_v13 = vpack.c.bf16 %v1686_v34, %v1685_v33  ;;  %v1676_v14 = vmul.f32 %v2420_v49, %v4486_v63  ;;  %v1703_v52 = vpack.c.bf16 %v1690_v46, %v1689_v54  ;;  %v2580_v63 = vld [vmem:[#allocation17 + $0xb0] sm:$0xff]   ;;  %v1679_v45 = vmul.f32 %v2427_v44, %v4493_v0 }
 0x2e4   :  { %v2431_v60 = vunpack.c.l.bf16 %v2580_v63  ;;  %v2432_v6 = vunpack.c.h.bf16 %v2580_v63  ;;  %v2435_v0 = vunpack.c.l.bf16 %v2581_v31 }
 0x2e5   :  { %v1692_v40 = vadd.f32 %v4488_v62, %v1676_v14  ;;  %v1695_v62 = vadd.f32 %v4495_v8, %v1679_v45  ;;  %v1684_v8 = vmul.f32 %v2436_v56, %v3875_v20 }
 0x2e6   :  { %v1681_v38 = vmul.f32 %v2431_v60, %v3861_v37  ;;  %v1682_v29 = vmul.f32 %v2432_v6, %v3863_v1 }
 0x2e7   :  { %v1704_v18 = vpack.c.bf16 %v1692_v40, %v1691_v3 }
 0x2e8   :  { %v1697_v15 = vadd.f32 %v3865_v25, %v1681_v38  ;;  %v1698_v2 = vadd.f32 %v3867_v42, %v1682_v29  ;;  %v1794_v25 = vld [vmem:[%s4095_s8 + $0x2] ss:$0 sm:$0xff] }
 0x2ea   :  { %v1707_v37 = vpack.c.bf16 %v1698_v2, %v1697_v15 }
 0x394   :  { %v1188_v21 = vpop.f32.mrb[8].mxu0 }
 0x395   :  { %v1189_v30 = vadd.f32 %v1788_v16, %v1188_v21  ;;  %v2760_v48 = vpop.f32.mrb[9].mxu0  ;;  %v1696_v16 = vadd.f32 %v4496_v24, %v1680_v17  ;;  %v1683_v21 = vmul.f32 %v2435_v0, %v3873_v12  ;;  %v1700_v24 = vadd.f32 %v3879_v57, %v1684_v8  ;;  %v1784_v57 = vld [vmem:[%s4099_s12] ss:$0 sm:$0xff] }
 0x396   :  { %v1191_v22 = vpop.f32.mrb[10].mxu0  ;;  %v1790_v48 = vld [vmem:[%s4099_s12 + $0x1] ss:$0 sm:$0xff] }
 0x397   :  { %v1194_v35 = vmax.f32 %v1189_v30, 0.0  ;;  %v2761_v32 = vpop.f32.mrb[11].mxu0  ;;  %v1706_v23 = vpack.c.bf16 %v1696_v16, %v1695_v62  ;;  %v1699_v1 = vadd.f32 %v3877_v7, %v1683_v21  ;;  %v2822_v50 = vadd.f32 %v1790_v48, %v1784_v57  ;;  %v1796_v22 = vld [vmem:[%s4099_s12 + $0x2] ss:$0 sm:$0xff] }
 0x399   :  { %v1195_v59 = vpack.c.bf16 %v1194_v35, %v1194_v35  ;;  %v1708_v42 = vpack.c.bf16 %v1700_v24, %v1699_v1 }
 0x39b   :  { %2779 = vmatmul.mubr.bf16.vlgmr.msra.gmra.mrb[4].mxu0 %v1195_v59 }
 0x39c   :  { %2803 = vmatpush3.bf16.msra.mxu0 %v1701_v13  ;;  %2818 = vmatprep.mubr.msk.bf16.mxu0 %vm3119_vm0, %v4440_v41 }
 0x39d   :  { %2804 = vmatprep.subr.bf16.mxu0 %v4440_v41 }
 0x3a0   :  { %2805 = vmatpush3.bf16.msra.mxu0 %v1702_v19 }
 0x3a1   :  { %2806 = vmatprep.subr.bf16.mxu0 %v4440_v41 }
 0x3a4   :  { %2807 = vmatpush3.bf16.msra.mxu0 %v1703_v52 }
 0x3a5   :  { %2808 = vmatprep.subr.bf16.mxu0 %v4440_v41 }
 0x3a8   :  { %2809 = vmatpush3.bf16.msra.mxu0 %v1704_v18 }
 0x3a9   :  { %2810 = vmatprep.subr.bf16.mxu0 %v4440_v41 }
 0x3ac   :  { %2811 = vmatpush3.bf16.msra.mxu0 %v1705_v51 }
 0x3ad   :  { %2812 = vmatprep.subr.bf16.mxu0 %v4440_v41 }
 0x3b0   :  { %2813 = vmatpush3.bf16.msra.mxu0 %v1706_v23 }
 0x3b1   :  { %2814 = vmatprep.subr.bf16.mxu0 %v4440_v41 }
 0x3b4   :  { %v1628_v33 = vpop.f32.mrb[12].mxu1  ;;  %2815 = vmatpush3.bf16.msra.mxu0 %v1707_v37 }
 0x3b5   :  { %v1629_v12 = vadd.f32 %v1794_v25, %v1628_v33  ;;  %v2800_v34 = vpop.f32.mrb[13].mxu1  ;;  %2816 = vmatprep.subr.bf16.mxu0 %v4440_v41  ;;  %v2823_v41 = vadd.f32 %v2822_v50, %v1796_v22 }
 0x3b6   :  { %v1631_v20 = vpop.f32.mrb[14].mxu1 }
 0x3b7   :  { %v1634_v5 = vmax.f32 %v1629_v12, 0.0  ;;  %v2801_v30 = vpop.f32.mrb[15].mxu1 }
 0x3b8   :  { %2817 = vmatpush3.bf16.msra.mxu0 %v1708_v42 }
 0x3b9   :  { %v1635_v7 = vpack.c.bf16 %v1634_v5, %v1634_v5 }
 0x3bb   :  { %2819 = vmatmul.mubr.bf16.vlgmr.msra.gmra.mrb[4].mxu0 %v1635_v7 }
 0x48e   :  { %v1751_v35 = vpop.f32.mrb[4].mxu0 }
 0x48f   :  { %v2824_v32 = vadd.f32 %v2823_v41, %v1751_v35  ;;  %v2820_v11 = vpop.f32.mrb[5].mxu0 }
 0x490   :  { %v1754_v58 = vpop.f32.mrb[6].mxu0 }
 0x491   :  { %v1758_v47 = vmul.f32 0.33333334, %v2824_v32  ;;  %v2821_v13 = vpop.f32.mrb[7].mxu0 }
 0x493   :  { %1759 = vst [vmem:[#allocation19] sm:$0xff] %v1758_v47 }
 0x494   :  { %3081 = shalt.err (!%p3078_p0)
}
 0x495   :  { %s3082_s0 = scalar_lea.hbm %s4100_s13, 128 }
 0x496   :  { %p3083_p1 = scmp.ne.s32.totalorder %s4100_s13, %s3082_s0  ;;  %p3086_p2 = scmp.lt.u32.totalorder %s3082_s0, %s4100_s13 }
 0x498   :  { %p3088_p3 = pnand %p3086_p2, %p3083_p1 }
 0x49a   :  { %3091 = shalt.err (!%p3088_p3)
}
 0x49b   :  { %1769 = dma.vmem_to_hbm [thread:$0]  %s1767_s29, 128, %s4100_s13, [#allocation4]  }
 0x49c   :  { %3104 = dma.done.wait [#allocation4], 128  }
 0x49d   :  { %3105 = vsyncadd [#allocation4], 4294967168 }
 0x49e   :  { %1773 = vsyncpa [#allocation3], 1 }
 0x49f   :  { %1774 = vsyncpa [#allocation6], 1 }
 0x4a0   :  { %1775 = vsyncpa [#allocation9], 1 }
 0x4a1   :  { %1776 = vsyncpa [#allocation12], 1 }
 0x4a2   :  { %1777 = vsyncpa [#allocation15], 1 }
 0x4a3   :  { %1778 = vsyncpa [#allocation18], 1 }
 0x4a4   :  { %1779 = vsyncpa [#allocation4], 1 }

</bundles_post_ra>
